<compile_context>
chip_gen: v7x
topology: tpu7x:2x2x1
jax: 0.10.0
libtpu: 0.0.40
codegen_flags: <defaults>
</compile_context>

<pallas_src>
import functools

import numpy as np
import jax
import jax.numpy as jnp
from jax.experimental import pallas as pl
from jax.experimental.pallas import tpu as pltpu

LN_EPS = 1e-5


# ----------------------------------------------------------------------------
# Pallas kernel
# ----------------------------------------------------------------------------
def _patch_expand_kernel(xp_ref, w_ref, b_ref, p_ref, g_ref, bt_ref, o_ref, *,
                         H, W, C, K):
    """One batch element per grid step.

    Computes, for every coarse pixel (h, w), all 4*Cout pre-norm outputs of
    [3x3 expand conv -> PixelShuffle(2) -> 1x1 channel reduction] (weights
    pre-folded into w_ref / b_ref), then a per-Cout-chunk LayerNorm, and
    writes a lane-dense (H*W, 4*Cout) slab.
    """
    M = H * W
    xp = xp_ref[0].astype(jnp.float32)                        # (H+2, W+2, C)

    acc = jnp.zeros((M, K), jnp.float32) + b_ref[...].astype(jnp.float32)
    for dy in range(3):
        for dx in range(3):
            # Statically shifted window of the padded input -> (H*W, C).
            xs = xp[dy:dy + H, dx:dx + W, :].reshape(M, C)
            acc = acc + jnp.dot(xs, w_ref[dy * 3 + dx],
                                preferred_element_type=jnp.float32)

    # Per-chunk LayerNorm via a block-diagonal averaging matrix: stats stay in
    # the same lane-dense (M, K) layout (no sub-128 column slicing/reshapes).
    mu = jnp.dot(acc, p_ref[...], preferred_element_type=jnp.float32)
    d = acc - mu
    var = jnp.dot(d * d, p_ref[...], preferred_element_type=jnp.float32)
    xn = d * jax.lax.rsqrt(var + LN_EPS)
    o_ref[0] = (xn * g_ref[...] + bt_ref[...]).astype(o_ref.dtype)


# ----------------------------------------------------------------------------
# Weight folding + wrapper
# ----------------------------------------------------------------------------
def fold_patch_expand_weights(we, be, wr):
    """Fold expand conv (3x3, C->4C) + PixelShuffle(2) + 1x1 conv (C->Cout).

    we: (4C, C, 3, 3)   be: (4C,)   wr: (Cout, C)
    Returns w_big (9, C, 4*Cout) and b_big (1, 4*Cout), with column chunk
    s = 2*i + j holding the Cout channels of output sub-pixel (i, j).
    """
    C4, Cin, _, _ = we.shape
    C = C4 // 4
    Cout = wr.shape[0]
    we_r = we.reshape(C, 4, Cin, 3, 3)   # expand channel e = c*4 + s
    # (dy, dx, ic, s, o) = sum_c We[c*4+s, ic, dy, dx] * Wr[o, c]
    wc = jnp.einsum('csiyx,oc->yxiso', we_r, wr)
    w_big = wc.reshape(9, Cin, 4 * Cout)
    b_big = jnp.einsum('cs,oc->so', be.reshape(C, 4), wr).reshape(1, 4 * Cout)
    return w_big, b_big


def patch_expand_forward(x, params, *, H, W):
    B, L, C = x.shape
    assert L == H * W, 'input feature has wrong size'
    wr = params['wr']
    Cout = wr.shape[0]
    K = 4 * Cout

    w_big, b_big = fold_patch_expand_weights(params['we'], params['be'], wr)
    gamma_t = jnp.tile(params['gamma'], 4).reshape(1, K)
    beta_t = jnp.tile(params['beta'], 4).reshape(1, K)
    idx = jnp.arange(K)
    pmat = jnp.where((idx[:, None] // Cout) == (idx[None, :] // Cout),
                     jnp.float32(1.0 / Cout), jnp.float32(0.0))

    # Zero-pad the spatial halo once (conv padding=1).
    x_pad = jnp.pad(x.reshape(B, H, W, C), ((0, 0), (1, 1), (1, 1), (0, 0)))

    kern = functools.partial(_patch_expand_kernel, H=H, W=W, C=C, K=K)
    z = pl.pallas_call(
        kern,
        out_shape=jax.ShapeDtypeStruct((B, H * W, K), x.dtype),
        grid=(B,),
        in_specs=[
            pl.BlockSpec((1, H + 2, W + 2, C), lambda b: (b, 0, 0, 0)),  # x
            pl.BlockSpec((9, C, K), lambda b: (0, 0, 0)),   # folded weights
            pl.BlockSpec((1, K), lambda b: (0, 0)),         # folded bias
            pl.BlockSpec((K, K), lambda b: (0, 0)),         # LN averaging mat
            pl.BlockSpec((1, K), lambda b: (0, 0)),         # gamma (tiled x4)
            pl.BlockSpec((1, K), lambda b: (0, 0)),         # beta  (tiled x4)
        ],
        out_specs=pl.BlockSpec((1, H * W, K), lambda b: (b, 0, 0)),
        compiler_params=pltpu.CompilerParams(
            dimension_semantics=("parallel",)),
    )(x_pad, w_big, b_big, pmat, gamma_t, beta_t)

    # PixelShuffle spatial interleave: pure layout plumbing, kept in XLA so
    # the kernel's output block stays lane-dense.
    z = z.reshape(B, H, W, 2, 2, Cout).transpose(0, 1, 3, 2, 4, 5)
    return z.reshape(B, 4 * L, Cout)


# ----------------------------------------------------------------------------
# Pure-JAX reference (unfused: conv3x3 -> pixel shuffle -> conv1x1 -> LN)
# ----------------------------------------------------------------------------
def reference_forward(x, params, *, H, W):
    B, L, C = x.shape
    we, be, wr = params['we'], params['be'], params['wr']
    gamma, beta = params['gamma'], params['beta']

    xi = x.reshape(B, H, W, C).transpose(0, 3, 1, 2)           # NCHW
    y = jax.lax.conv_general_dilated(
        xi, we, window_strides=(1, 1), padding=((1, 1), (1, 1)),
        dimension_numbers=('NCHW', 'OIHW', 'NCHW'))
    y = y + be[None, :, None, None]

    # PixelShuffle(2)
    r = 2
    Bc, Crr, Hc, Wc = y.shape
    Cps = Crr // (r * r)
    y = y.reshape(Bc, Cps, r, r, Hc, Wc).transpose(0, 1, 4, 2, 5, 3)
    y = y.reshape(Bc, Cps, Hc * r, Wc * r)

    # 1x1 conv, no bias
    z = jnp.einsum('oc,bchw->bohw', wr, y)

    # to tokens + LayerNorm over the channel dim
    z = z.transpose(0, 2, 3, 1).reshape(B, -1, wr.shape[0])
    mu = z.mean(-1, keepdims=True)
    var = ((z - mu) ** 2).mean(-1, keepdims=True)
    return (z - mu) / jnp.sqrt(var + LN_EPS) * gamma + beta


# ----------------------------------------------------------------------------
if __name__ == "__main__":
    # PatchExpand(input_resolution=(16, 16), dim=64, dim_scale=2); batch = 2.
    B, H, W, dim = 2, 16, 16, 64
    Cout = dim // 2

    key = jax.random.PRNGKey(0)
    kx, k1, k2, k3, k4, k5 = jax.random.split(key, 6)
    x = jax.random.normal(kx, (B, H * W, dim), jnp.float32)
    params = {
        'we': 0.05 * jax.random.normal(k1, (4 * dim, dim, 3, 3), jnp.float32),
        'be': 0.05 * jax.random.normal(k2, (4 * dim,), jnp.float32),
        'wr': 0.05 * jax.random.normal(k3, (Cout, dim), jnp.float32),
        'gamma': 1.0 + 0.1 * jax.random.normal(k4, (Cout,), jnp.float32),
        'beta': 0.1 * jax.random.normal(k5, (Cout,), jnp.float32),
    }

    fwd = jax.jit(functools.partial(patch_expand_forward, H=H, W=W))
    out = jax.block_until_ready(fwd(x, params))
    assert out.shape == (B, 4 * H * W, Cout)

    ref = jax.block_until_ready(reference_forward(x, params, H=H, W=W))
    np.testing.assert_allclose(np.asarray(out), np.asarray(ref),
                               rtol=1e-3, atol=1e-3)
    print("KERNEL_OK")
</pallas_src>

<mosaic_0001>
module attributes {stable_mosaic.version = 11 : i64} {
  func.func @_patch_expand_kernel(%arg0: i32, %arg1: memref<1x18x18x64xf32, #tpu.memory_space<vmem>>, %arg2: memref<9x64x128xf32, #tpu.memory_space<vmem>>, %arg3: memref<1x128xf32, #tpu.memory_space<vmem>>, %arg4: memref<128x128xf32, #tpu.memory_space<vmem>>, %arg5: memref<1x128xf32, #tpu.memory_space<vmem>>, %arg6: memref<1x128xf32, #tpu.memory_space<vmem>>, %arg7: memref<1x256x128xf32, #tpu.memory_space<vmem>>) attributes {dimension_semantics = [#tpu.dimension_semantics<parallel>], iteration_bounds = array<i64: 2>, scalar_prefetch = 0 : i64, scratch_operands = 0 : i64, tpu.core_type = #tpu.core_type<tc>, window_params = [{transform_indices = @transform_0, window_bounds = array<i64: 1, 18, 18, 64>}, {pipeline_mode = #tpu.pipeline_mode<synchronous>, transform_indices = @transform_1, window_bounds = array<i64: 9, 64, 128>}, {pipeline_mode = #tpu.pipeline_mode<synchronous>, transform_indices = @transform_2, window_bounds = array<i64: 1, 128>}, {pipeline_mode = #tpu.pipeline_mode<synchronous>, transform_indices = @transform_3, window_bounds = array<i64: 128, 128>}, {pipeline_mode = #tpu.pipeline_mode<synchronous>, transform_indices = @transform_4, window_bounds = array<i64: 1, 128>}, {pipeline_mode = #tpu.pipeline_mode<synchronous>, transform_indices = @transform_5, window_bounds = array<i64: 1, 128>}, {transform_indices = @transform_6, window_bounds = array<i64: 1, 256, 128>}]} {
    %c0 = arith.constant 0 : index
    %c0_0 = arith.constant 0 : index
    %c0_1 = arith.constant 0 : index
    %c0_2 = arith.constant 0 : index
    %0 = vector.load %arg1[%c0, %c0_0, %c0_1, %c0_2] : memref<1x18x18x64xf32, #tpu.memory_space<vmem>>, vector<1x18x18x64xf32>
    %1 = vector.shape_cast %0 : vector<1x18x18x64xf32> to vector<18x18x64xf32>
    %cst = arith.constant 0.000000e+00 : f32
    %2 = vector.broadcast %cst : f32 to vector<256x128xf32>
    %c0_3 = arith.constant 0 : index
    %c0_4 = arith.constant 0 : index
    %3 = vector.load %arg3[%c0_3, %c0_4] : memref<1x128xf32, #tpu.memory_space<vmem>>, vector<1x128xf32>
    %4 = vector.broadcast %3 : vector<1x128xf32> to vector<256x128xf32>
    %5 = arith.addf %2, %4 : vector<256x128xf32>
    %6 = vector.extract_strided_slice %1 {offsets = [0, 0, 0], sizes = [16, 16, 64], strides = [1, 1, 1]} : vector<18x18x64xf32> to vector<16x16x64xf32>
    %7 = vector.shape_cast %6 : vector<16x16x64xf32> to vector<256x64xf32>
    %c0_5 = arith.constant 0 : index
    %c0_6 = arith.constant 0 : index
    %c0_7 = arith.constant 0 : index
    %8 = vector.load %arg2[%c0_5, %c0_6, %c0_7] : memref<9x64x128xf32, #tpu.memory_space<vmem>>, vector<1x64x128xf32>
    %9 = vector.shape_cast %8 : vector<1x64x128xf32> to vector<64x128xf32>
    %cst_8 = arith.constant dense<0.000000e+00> : vector<256x128xf32>
    %10 = tpu.matmul %7, %9, %cst_8 {dimension_numbers = #tpu.dot_dimension_numbers<[1], [0], [0], [1], [0, 0, 1, 1], [], []>} : vector<256x64xf32>, vector<64x128xf32>, vector<256x128xf32> -> vector<256x128xf32>
    %11 = arith.addf %5, %10 : vector<256x128xf32>
    %12 = vector.extract_strided_slice %1 {offsets = [0, 1, 0], sizes = [16, 16, 64], strides = [1, 1, 1]} : vector<18x18x64xf32> to vector<16x16x64xf32>
    %13 = vector.shape_cast %12 : vector<16x16x64xf32> to vector<256x64xf32>
    %c1 = arith.constant 1 : index
    %c0_9 = arith.constant 0 : index
    %c0_10 = arith.constant 0 : index
    %14 = vector.load %arg2[%c1, %c0_9, %c0_10] : memref<9x64x128xf32, #tpu.memory_space<vmem>>, vector<1x64x128xf32>
    %15 = vector.shape_cast %14 : vector<1x64x128xf32> to vector<64x128xf32>
    %cst_11 = arith.constant dense<0.000000e+00> : vector<256x128xf32>
    %16 = tpu.matmul %13, %15, %cst_11 {dimension_numbers = #tpu.dot_dimension_numbers<[1], [0], [0], [1], [0, 0, 1, 1], [], []>} : vector<256x64xf32>, vector<64x128xf32>, vector<256x128xf32> -> vector<256x128xf32>
    %17 = arith.addf %11, %16 : vector<256x128xf32>
    %18 = vector.extract_strided_slice %1 {offsets = [0, 2, 0], sizes = [16, 16, 64], strides = [1, 1, 1]} : vector<18x18x64xf32> to vector<16x16x64xf32>
    %19 = vector.shape_cast %18 : vector<16x16x64xf32> to vector<256x64xf32>
    %c2 = arith.constant 2 : index
    %c0_12 = arith.constant 0 : index
    %c0_13 = arith.constant 0 : index
    %20 = vector.load %arg2[%c2, %c0_12, %c0_13] : memref<9x64x128xf32, #tpu.memory_space<vmem>>, vector<1x64x128xf32>
    %21 = vector.shape_cast %20 : vector<1x64x128xf32> to vector<64x128xf32>
    %cst_14 = arith.constant dense<0.000000e+00> : vector<256x128xf32>
    %22 = tpu.matmul %19, %21, %cst_14 {dimension_numbers = #tpu.dot_dimension_numbers<[1], [0], [0], [1], [0, 0, 1, 1], [], []>} : vector<256x64xf32>, vector<64x128xf32>, vector<256x128xf32> -> vector<256x128xf32>
    %23 = arith.addf %17, %22 : vector<256x128xf32>
    %24 = vector.extract_strided_slice %1 {offsets = [1, 0, 0], sizes = [16, 16, 64], strides = [1, 1, 1]} : vector<18x18x64xf32> to vector<16x16x64xf32>
    %25 = vector.shape_cast %24 : vector<16x16x64xf32> to vector<256x64xf32>
    %c3 = arith.constant 3 : index
    %c0_15 = arith.constant 0 : index
    %c0_16 = arith.constant 0 : index
    %26 = vector.load %arg2[%c3, %c0_15, %c0_16] : memref<9x64x128xf32, #tpu.memory_space<vmem>>, vector<1x64x128xf32>
    %27 = vector.shape_cast %26 : vector<1x64x128xf32> to vector<64x128xf32>
    %cst_17 = arith.constant dense<0.000000e+00> : vector<256x128xf32>
    %28 = tpu.matmul %25, %27, %cst_17 {dimension_numbers = #tpu.dot_dimension_numbers<[1], [0], [0], [1], [0, 0, 1, 1], [], []>} : vector<256x64xf32>, vector<64x128xf32>, vector<256x128xf32> -> vector<256x128xf32>
    %29 = arith.addf %23, %28 : vector<256x128xf32>
    %30 = vector.extract_strided_slice %1 {offsets = [1, 1, 0], sizes = [16, 16, 64], strides = [1, 1, 1]} : vector<18x18x64xf32> to vector<16x16x64xf32>
    %31 = vector.shape_cast %30 : vector<16x16x64xf32> to vector<256x64xf32>
    %c4 = arith.constant 4 : index
    %c0_18 = arith.constant 0 : index
    %c0_19 = arith.constant 0 : index
    %32 = vector.load %arg2[%c4, %c0_18, %c0_19] : memref<9x64x128xf32, #tpu.memory_space<vmem>>, vector<1x64x128xf32>
    %33 = vector.shape_cast %32 : vector<1x64x128xf32> to vector<64x128xf32>
    %cst_20 = arith.constant dense<0.000000e+00> : vector<256x128xf32>
    %34 = tpu.matmul %31, %33, %cst_20 {dimension_numbers = #tpu.dot_dimension_numbers<[1], [0], [0], [1], [0, 0, 1, 1], [], []>} : vector<256x64xf32>, vector<64x128xf32>, vector<256x128xf32> -> vector<256x128xf32>
    %35 = arith.addf %29, %34 : vector<256x128xf32>
    %36 = vector.extract_strided_slice %1 {offsets = [1, 2, 0], sizes = [16, 16, 64], strides = [1, 1, 1]} : vector<18x18x64xf32> to vector<16x16x64xf32>
    %37 = vector.shape_cast %36 : vector<16x16x64xf32> to vector<256x64xf32>
    %c5 = arith.constant 5 : index
    %c0_21 = arith.constant 0 : index
    %c0_22 = arith.constant 0 : index
    %38 = vector.load %arg2[%c5, %c0_21, %c0_22] : memref<9x64x128xf32, #tpu.memory_space<vmem>>, vector<1x64x128xf32>
    %39 = vector.shape_cast %38 : vector<1x64x128xf32> to vector<64x128xf32>
    %cst_23 = arith.constant dense<0.000000e+00> : vector<256x128xf32>
    %40 = tpu.matmul %37, %39, %cst_23 {dimension_numbers = #tpu.dot_dimension_numbers<[1], [0], [0], [1], [0, 0, 1, 1], [], []>} : vector<256x64xf32>, vector<64x128xf32>, vector<256x128xf32> -> vector<256x128xf32>
    %41 = arith.addf %35, %40 : vector<256x128xf32>
    %42 = vector.extract_strided_slice %1 {offsets = [2, 0, 0], sizes = [16, 16, 64], strides = [1, 1, 1]} : vector<18x18x64xf32> to vector<16x16x64xf32>
    %43 = vector.shape_cast %42 : vector<16x16x64xf32> to vector<256x64xf32>
    %c6 = arith.constant 6 : index
    %c0_24 = arith.constant 0 : index
    %c0_25 = arith.constant 0 : index
    %44 = vector.load %arg2[%c6, %c0_24, %c0_25] : memref<9x64x128xf32, #tpu.memory_space<vmem>>, vector<1x64x128xf32>
    %45 = vector.shape_cast %44 : vector<1x64x128xf32> to vector<64x128xf32>
    %cst_26 = arith.constant dense<0.000000e+00> : vector<256x128xf32>
    %46 = tpu.matmul %43, %45, %cst_26 {dimension_numbers = #tpu.dot_dimension_numbers<[1], [0], [0], [1], [0, 0, 1, 1], [], []>} : vector<256x64xf32>, vector<64x128xf32>, vector<256x128xf32> -> vector<256x128xf32>
    %47 = arith.addf %41, %46 : vector<256x128xf32>
    %48 = vector.extract_strided_slice %1 {offsets = [2, 1, 0], sizes = [16, 16, 64], strides = [1, 1, 1]} : vector<18x18x64xf32> to vector<16x16x64xf32>
    %49 = vector.shape_cast %48 : vector<16x16x64xf32> to vector<256x64xf32>
    %c7 = arith.constant 7 : index
    %c0_27 = arith.constant 0 : index
    %c0_28 = arith.constant 0 : index
    %50 = vector.load %arg2[%c7, %c0_27, %c0_28] : memref<9x64x128xf32, #tpu.memory_space<vmem>>, vector<1x64x128xf32>
    %51 = vector.shape_cast %50 : vector<1x64x128xf32> to vector<64x128xf32>
    %cst_29 = arith.constant dense<0.000000e+00> : vector<256x128xf32>
    %52 = tpu.matmul %49, %51, %cst_29 {dimension_numbers = #tpu.dot_dimension_numbers<[1], [0], [0], [1], [0, 0, 1, 1], [], []>} : vector<256x64xf32>, vector<64x128xf32>, vector<256x128xf32> -> vector<256x128xf32>
    %53 = arith.addf %47, %52 : vector<256x128xf32>
    %54 = vector.extract_strided_slice %1 {offsets = [2, 2, 0], sizes = [16, 16, 64], strides = [1, 1, 1]} : vector<18x18x64xf32> to vector<16x16x64xf32>
    %55 = vector.shape_cast %54 : vector<16x16x64xf32> to vector<256x64xf32>
    %c8 = arith.constant 8 : index
    %c0_30 = arith.constant 0 : index
    %c0_31 = arith.constant 0 : index
    %56 = vector.load %arg2[%c8, %c0_30, %c0_31] : memref<9x64x128xf32, #tpu.memory_space<vmem>>, vector<1x64x128xf32>
    %57 = vector.shape_cast %56 : vector<1x64x128xf32> to vector<64x128xf32>
    %cst_32 = arith.constant dense<0.000000e+00> : vector<256x128xf32>
    %58 = tpu.matmul %55, %57, %cst_32 {dimension_numbers = #tpu.dot_dimension_numbers<[1], [0], [0], [1], [0, 0, 1, 1], [], []>} : vector<256x64xf32>, vector<64x128xf32>, vector<256x128xf32> -> vector<256x128xf32>
    %59 = arith.addf %53, %58 : vector<256x128xf32>
    %c0_33 = arith.constant 0 : index
    %c0_34 = arith.constant 0 : index
    %60 = vector.load %arg4[%c0_33, %c0_34] : memref<128x128xf32, #tpu.memory_space<vmem>>, vector<128x128xf32>
    %cst_35 = arith.constant dense<0.000000e+00> : vector<256x128xf32>
    %61 = tpu.matmul %59, %60, %cst_35 {dimension_numbers = #tpu.dot_dimension_numbers<[1], [0], [0], [1], [0, 0, 1, 1], [], []>} : vector<256x128xf32>, vector<128x128xf32>, vector<256x128xf32> -> vector<256x128xf32>
    %62 = arith.subf %59, %61 : vector<256x128xf32>
    %63 = arith.mulf %62, %62 : vector<256x128xf32>
    %c0_36 = arith.constant 0 : index
    %c0_37 = arith.constant 0 : index
    %64 = vector.load %arg4[%c0_36, %c0_37] : memref<128x128xf32, #tpu.memory_space<vmem>>, vector<128x128xf32>
    %cst_38 = arith.constant dense<0.000000e+00> : vector<256x128xf32>
    %65 = tpu.matmul %63, %64, %cst_38 {dimension_numbers = #tpu.dot_dimension_numbers<[1], [0], [0], [1], [0, 0, 1, 1], [], []>} : vector<256x128xf32>, vector<128x128xf32>, vector<256x128xf32> -> vector<256x128xf32>
    %cst_39 = arith.constant 9.99999974E-6 : f32
    %66 = vector.broadcast %cst_39 : f32 to vector<256x128xf32>
    %67 = arith.addf %65, %66 : vector<256x128xf32>
    %68 = math.rsqrt %67 : vector<256x128xf32>
    %69 = arith.mulf %62, %68 : vector<256x128xf32>
    %c0_40 = arith.constant 0 : index
    %c0_41 = arith.constant 0 : index
    %70 = vector.load %arg5[%c0_40, %c0_41] : memref<1x128xf32, #tpu.memory_space<vmem>>, vector<1x128xf32>
    %71 = vector.broadcast %70 : vector<1x128xf32> to vector<256x128xf32>
    %72 = arith.mulf %69, %71 : vector<256x128xf32>
    %c0_42 = arith.constant 0 : index
    %c0_43 = arith.constant 0 : index
    %73 = vector.load %arg6[%c0_42, %c0_43] : memref<1x128xf32, #tpu.memory_space<vmem>>, vector<1x128xf32>
    %74 = vector.broadcast %73 : vector<1x128xf32> to vector<256x128xf32>
    %75 = arith.addf %72, %74 : vector<256x128xf32>
    %c0_44 = arith.constant 0 : index
    %c0_45 = arith.constant 0 : index
    %c0_46 = arith.constant 0 : index
    %76 = vector.load %arg7[%c0_44, %c0_45, %c0_46] : memref<1x256x128xf32, #tpu.memory_space<vmem>>, vector<1x256x128xf32>
    %77 = vector.shape_cast %76 : vector<1x256x128xf32> to vector<256x128xf32>
    %78 = vector.shape_cast %75 : vector<256x128xf32> to vector<1x256x128xf32>
    tpu.vector_store %arg7[%c0_44, %c0_45, %c0_46], %78 {strides = array<i32>} : memref<1x256x128xf32, #tpu.memory_space<vmem>>, vector<1x256x128xf32>,
    return
  }
  func.func @transform_0(%arg0: i32) -> (i32, i32, i32, i32) {
    %c0_i32 = arith.constant 0 : i32
    %c0_i32_0 = arith.constant 0 : i32
    %c0_i32_1 = arith.constant 0 : i32
    %c0_i32_2 = arith.constant 0 : i32
    return %arg0, %c0_i32, %c0_i32_0, %c0_i32_1 : i32, i32, i32, i32
  }
  func.func @transform_1(%arg0: i32) -> (i32, i32, i32) {
    %c0_i32 = arith.constant 0 : i32
    %c0_i32_0 = arith.constant 0 : i32
    %c0_i32_1 = arith.constant 0 : i32
    %c0_i32_2 = arith.constant 0 : i32
    return %c0_i32, %c0_i32_0, %c0_i32_1 : i32, i32, i32
  }
  func.func @transform_2(%arg0: i32) -> (i32, i32) {
    %c0_i32 = arith.constant 0 : i32
    %c0_i32_0 = arith.constant 0 : i32
    %c0_i32_1 = arith.constant 0 : i32
    return %c0_i32, %c0_i32_0 : i32, i32
  }
  func.func @transform_3(%arg0: i32) -> (i32, i32) {
    %c0_i32 = arith.constant 0 : i32
    %c0_i32_0 = arith.constant 0 : i32
    %c0_i32_1 = arith.constant 0 : i32
    return %c0_i32, %c0_i32_0 : i32, i32
  }
  func.func @transform_4(%arg0: i32) -> (i32, i32) {
    %c0_i32 = arith.constant 0 : i32
    %c0_i32_0 = arith.constant 0 : i32
    %c0_i32_1 = arith.constant 0 : i32
    return %c0_i32, %c0_i32_0 : i32, i32
  }
  func.func @transform_5(%arg0: i32) -> (i32, i32) {
    %c0_i32 = arith.constant 0 : i32
    %c0_i32_0 = arith.constant 0 : i32
    %c0_i32_1 = arith.constant 0 : i32
    return %c0_i32, %c0_i32_0 : i32, i32
  }
  func.func @transform_6(%arg0: i32) -> (i32, i32, i32) {
    %c0_i32 = arith.constant 0 : i32
    %c0_i32_0 = arith.constant 0 : i32
    %c0_i32_1 = arith.constant 0 : i32
    return %arg0, %c0_i32, %c0_i32_0 : i32, i32, i32
  }
}

</mosaic_0001>

<bundles_post_ra>
// kernel: tile.18
= control target key start
LH: loop header
LB: loop body
LE: loop exit
PB: predicated region body
PF: predicated region fallthrough
CT: control target
= control target key end

     0   :  { %s22_s0 = inlined_call_operand.vmem [shape: f32[32], index: 0, kind: input, shape index: {}]   ;;  %s23_s1 = inlined_call_operand.vmem [shape: f32[4,32], index: 1, kind: output, shape index: {}]  }
   0x1   :  { %v4_v0 = vld [vmem:[%s22_s0] ss:$0 sm:$0xff] }
   0x2   :  { %5 = vst [vmem:[%s23_s1] sm:$0xf] %v4_v0 }

// kernel: tile.19
= control target key start
LH: loop header
LB: loop body
LE: loop exit
PB: predicated region body
PF: predicated region fallthrough
CT: control target
= control target key end

     0   :  { %vm7_vm0 = vcmask 261120   ;;  %s37_s8 = smov 32   ;;  %s38_s9 = smov 64   ;;  %vm13_vm1 = vcmask 1048320   ;;  %vm19_vm2 = vcmask 785920   ;;  %vm25_vm3 = vcmask 523520   ;;  %s55_s0 = inlined_call_operand.vmem [shape: f32[4,32], index: 0, kind: input, shape index: {}]   ;;  %s56_s1 = inlined_call_operand.vmem [shape: f32[1,128], index: 1, kind: output, shape index: {}]  }
   0x1   :  { %v4_v0 = vld [vmem:[%s55_s0] sm:$0xf]  ;;  %s36_s0 = smov 96  }
   0x2   :  { %5 = vst [vmem:[#allocation1] sm:$0xf] %v4_v0 }
   0x9   :  { %v10_v1 = vld [vmem:[#allocation1 + $0x3] sm:$0x1]   ;;  %v22_v2 = vld [vmem:[#allocation1 + $0x1] sm:$0x1]   ;;  %v6_v3 = vld [vmem:[#allocation1] sm:$0x1]  }
   0xa   :  { %11 = vrot.lane.b32.xlu0 %v10_v1, %s36_s0  ;;  %23 = vrot.lane.b32.xlu1 %v22_v2, %s37_s8  ;;  %v16_v4 = vld [vmem:[#allocation1 + $0x2] sm:$0x1]   ;;  %8 = vst.msk [vmem:[#allocation0] sm:$0x1] %vm7_vm0, %v6_v3  }
   0xe   :  { %17 = vrot.lane.b32.xlu0 %v16_v4, %s38_s9 }
  0x7c   :  { %v12_v5 = vpop.permute.xlu0 %11   ;;  %v24_v6 = vpop.permute.xlu1 %23  }
  0x7d   :  { %14 = vst.msk [vmem:[#allocation0] sm:$0x1] %vm13_vm1, %v12_v5  }
  0x80   :  { %v18_v7 = vpop.permute.xlu0 %17  }
  0x81   :  { %20 = vst.msk [vmem:[#allocation0] sm:$0x1] %vm19_vm2, %v18_v7  }
  0x82   :  { %26 = vst.msk [vmem:[#allocation0] sm:$0x1] %vm25_vm3, %v24_v6  }
  0x89   :  { %v30_v8 = vld [vmem:[#allocation0] sm:$0x1] }
  0x8a   :  { %32 = vst [vmem:[%s56_s1] sm:$0x1] %v30_v8 }

// kernel: patch_expand_forward.1
= control target key start
LH: loop header
LB: loop body
LE: loop exit
PB: predicated region body
PF: predicated region fallthrough
CT: control target
= control target key end

     0   :  { %s6097_s21 = smov 0   ;;  %s8025_s0 = inlined_call_operand.vmem [shape: f32[2,18,18,64], index: 0, kind: input, shape index: {}]   ;;  %s8026_s1 = inlined_call_operand.vmem [shape: f32[9,64,128], index: 1, kind: input, shape index: {}]   ;;  %s8027_s2 = inlined_call_operand.vmem [shape: f32[1,128], index: 2, kind: input, shape index: {}]   ;;  %s8028_s3 = inlined_call_operand.vmem [shape: f32[128,128], index: 3, kind: input, shape index: {}]   ;;  %s8029_s4 = inlined_call_operand.vmem [shape: f32[1,128], index: 4, kind: input, shape index: {}]   ;;  %s8030_s5 = inlined_call_operand.vmem [shape: f32[1,128], index: 5, kind: input, shape index: {}]   ;;  %s8031_s6 = inlined_call_operand.vmem [shape: f32[2,256,128], index: 6, kind: output, shape index: {}]  }
   0x1 LB: > { %s3919_s22 = sadd.s32 4294967295, %s6060_s21   ;;  %p3923_p0 = scmp.ge.s32.totalorder %s6060_s21, 1  ;;  %s6060_s21 = sphi %s6097_s21, %s16_s21  }
   0x2   : > { %p212_p1 = scmp.lt.s32.totalorder %s6060_s21, 3 }
   0x4   : > { %p213_p2 = pnand %p3923_p0, %p212_p1 }
   0x6   : > { %216 = sbr.rel (%p213_p2) target bundleno = 1048 (0x418), region = 44 }
   0xd   : > { %v314_v0 = vld [vmem:[%s8026_s1] sm:$0xff]  ;;  %v315_v1 = vld [vmem:[%s8026_s1 + $0x8] sm:$0xff]  ;;  %p242_p3 = scmp.lt.s32.totalorder %s3919_s22, 1  ;;  %v316_v5 = vld [vmem:[%s8026_s1 + $0x10] sm:$0xff]  ;;  %vm322_vm0 = vcmask 523264   ;;  %vm1103_vm1 = vcmask 1045504  }
   0xe   : > { %v4040_v2 = vld [vmem:[%s8026_s1 + $0xc0] sm:$0xff]  ;;  %v5477_v3 = vpack.c.bf16 %v315_v1, %v314_v0  ;;  %v4041_v4 = vld [vmem:[%s8026_s1 + $0xc8] sm:$0xff]  ;;  %v317_v6 = vld [vmem:[%s8026_s1 + $0x18] sm:$0xff]  ;;  %vm692_vm2 = vcmask 1046528  }
   0xf   : > { %v6123_v7 = vpack.c.bf16 %v4041_v4, %v4040_v2  ;;  %v5481_v8 = vpack.c.bf16 %v317_v6, %v316_v5  ;;  %v4042_v9 = vld [vmem:[%s8026_s1 + $0xd0] sm:$0xff]  ;;  %v4043_v10 = vld [vmem:[%s8026_s1 + $0xd8] sm:$0xff]  ;;  %v318_v11 = vld [vmem:[%s8026_s1 + $0x20] sm:$0xff]  ;;  %s8196_s22 = smov (!%p242_p3, %s3919_s22), 1 }
  0x10   : > { %5478 = vmatprep.subr.bf16.mxu1 %v5477_v3  ;;  %v6136_v12 = vpack.c.bf16 %v4043_v10, %v4042_v9  ;;  %v319_v13 = vld [vmem:[%s8026_s1 + $0x28] sm:$0xff]  ;;  %v4044_v14 = vld [vmem:[%s8026_s1 + $0xe0] sm:$0xff]  ;;  %s5981_s25 = smul.u32 432, %s8196_s22  ;;  %v320_v18 = vld [vmem:[%s8026_s1 + $0x30] sm:$0xff]  ;;  %s4284_s12 = sshll.u32 %s8196_s22, 8 }
  0x11   : > { %v4045_v15 = vld [vmem:[%s8026_s1 + $0xe8] sm:$0xff]  ;;  %5526 = vmatprep.subr.bf16.mxu0 %v6123_v7  ;;  %5480 = vmatpush3.bf16.msra.mxu1 %v5477_v3  ;;  %v5485_v16 = vpack.c.bf16 %v319_v13, %v318_v11  ;;  %v321_v19 = vld [vmem:[%s8026_s1 + $0x38] sm:$0xff]  ;;  %v4046_v20 = vld [vmem:[%s8026_s1 + $0xf0] sm:$0xff]  ;;  %s7895_s22 = scalar_lea.vmem %s8031_s6, %s4284_s12 }
  0x12   : > { %8094 = vst [vmem:[#allocation2_spill] sm:$0xff] %v6136_v12  ;;  %5528 = vmatpush3.bf16.msra.mxu0 %v6123_v7  ;;  %5482 = vmatprep.subr.bf16.mxu1 %v5481_v8  ;;  %v6151_v17 = vpack.c.bf16 %v4045_v15, %v4044_v14  ;;  %s6165_s10 = scalar_lea.vmem %s8025_s0, %s5981_s25  ;;  %v4047_v21 = vld [vmem:[%s8026_s1 + $0xf8] sm:$0xff]  ;;  %v5489_v24 = vpack.c.bf16 %v321_v19, %v320_v18  ;;  %v4080_v26 = vld [vmem:[%s8026_s1 + $0x100] sm:$0xff]  ;;  %v4081_v27 = vld [vmem:[%s8026_s1 + $0x108] sm:$0xff] }
  0x13   : > { %5530 = vmatprep.subr.bf16.mxu0 %v6136_v12  ;;  %v6171_v22 = vld [vmem:[%s6165_s10] sm:$0xff]  ;;  %v6174_v23 = vld [vmem:[%s6165_s10 + $0x18] sm:$0xff]  ;;  %v6180_v25 = vpack.c.bf16 %v4047_v21, %v4046_v20  ;;  %v6192_v28 = vld [vmem:[%s6165_s10 + $0x8] sm:$0xff]  ;;  %v5541_v30 = vpack.c.bf16 %v4081_v27, %v4080_v26 }
  0x14   : > { %8095 = vst [vmem:[#allocation3_spill] sm:$0xff] %v6151_v17  ;;  %4757 = vmatprep.mubr.msk.f32.mxu1 %vm322_vm0, %v6171_v22  ;;  %4949 = vmatprep.mubr.msk.f32.mxu0 %vm322_vm0, %v6174_v23  ;;  %v6195_v29 = vld [vmem:[%s6165_s10 + $0x20] sm:$0xff]  ;;  %v1104_v31 = vrot.slane %v6171_v22, 2  ;;  %v1109_v32 = vrot.slane %v6174_v23, 2  ;;  %v1105_v33 = vrot.slane %v6192_v28, 2  ;;  %v4082_v35 = vld [vmem:[%s8026_s1 + $0x110] sm:$0xff] }
  0x15   : > { %5484 = vmatpush3.bf16.msra.mxu1 %v5481_v8  ;;  %8096 = vst [vmem:[#allocation4_spill] sm:$0xff] %v6180_v25  ;;  %v1110_v34 = vrot.slane %v6195_v29, 2  ;;  %v4083_v36 = vld [vmem:[%s8026_s1 + $0x118] sm:$0xff]  ;;  %v6210_v37 = vld [vmem:[%s6165_s10 + $0x30] sm:$0xff]  ;;  %v4084_v39 = vld [vmem:[%s8026_s1 + $0x120] sm:$0xff]  ;;  %v698_v18 = vrot.slane %v6174_v23, 1 }
  0x16   : > { %5532 = vmatpush3.bf16.msra.mxu0 %v6136_v12  ;;  %5486 = vmatprep.subr.bf16.mxu1 %v5485_v16  ;;  %v5545_v38 = vpack.c.bf16 %v4083_v36, %v4082_v35  ;;  %v6223_v41 = vsel %vm1103_vm1, %v1104_v31, %v1105_v33  ;;  %v4085_v42 = vld [vmem:[%s8026_s1 + $0x128] sm:$0xff]  ;;  %v3960_v43 = vld [vmem:[%s8026_s1 + $0x40] sm:$0xff]  ;;  %v6243_v46 = vld [vmem:[%s6165_s10 + $0x38] sm:$0xff]  ;;  %v699_v19 = vrot.slane %v6195_v29, 1 }
  0x17   : > { %5534 = vmatprep.subr.bf16.mxu0 %v6151_v17  ;;  %v6218_v40 = vsel %vm1103_vm1, %v1109_v32, %v1110_v34  ;;  %8097 = vst [vmem:[#allocation5_spill] sm:$0xff] %v6223_v41  ;;  %v3961_v44 = vld [vmem:[%s8026_s1 + $0x48] sm:$0xff]  ;;  %v3962_v47 = vld [vmem:[%s8026_s1 + $0x50] sm:$0xff]  ;;  %v5549_v49 = vpack.c.bf16 %v4085_v42, %v4084_v39  ;;  %v3963_v50 = vld [vmem:[%s8026_s1 + $0x58] sm:$0xff] }
  0x18   : > { %v5493_v45 = vpack.c.bf16 %v3961_v44, %v3960_v43  ;;  %v6249_v48 = vld [vmem:[%s6165_s10 + $0x48] sm:$0xff]  ;;  %v4086_v51 = vld [vmem:[%s8026_s1 + $0x130] sm:$0xff]  ;;  %v4087_v52 = vld [vmem:[%s8026_s1 + $0x138] sm:$0xff]  ;;  %v5497_v53 = vpack.c.bf16 %v3963_v50, %v3962_v47  ;;  %v6384_v27 = vsel %vm692_vm2, %v698_v18, %v699_v19 }
  0x19   : > { %5488 = vmatpush3.bf16.msra.mxu1 %v5485_v16  ;;  %v3964_v54 = vld [vmem:[%s8026_s1 + $0x60] sm:$0xff]  ;;  %v3965_v55 = vld [vmem:[%s8026_s1 + $0x68] sm:$0xff]  ;;  %v6275_v56 = vld [vmem:[%s6165_s10 + $0x50] sm:$0xff]  ;;  %v5553_v58 = vpack.c.bf16 %v4087_v52, %v4086_v51  ;;  %v708_v42 = vrot.slane %v6249_v48, 1 }
  0x1a   : > { %5536 = vmatpush3.bf16.msra.mxu0 %v6151_v17  ;;  %5490 = vmatprep.subr.bf16.mxu1 %v5489_v24  ;;  %v6278_v57 = vld [vmem:[%s6165_s10 + $0x60] sm:$0xff]  ;;  %v4121_v60 = vld [vmem:[%s8026_s1 + $0x148] sm:$0xff]  ;;  %v5501_v61 = vpack.c.bf16 %v3965_v55, %v3964_v54  ;;  %v3966_v62 = vld [vmem:[%s8026_s1 + $0x70] sm:$0xff]  ;;  %v709_v43 = vrot.slane %v6275_v56, 1 }
  0x1b   : > { %5538 = vmatprep.subr.bf16.mxu0 %v6180_v25  ;;  %v4120_v59 = vld [vmem:[%s8026_s1 + $0x140] sm:$0xff]  ;;  %v3967_v63 = vld [vmem:[%s8026_s1 + $0x78] sm:$0xff]  ;;  %v6301_v0 = vld [vmem:[%s6165_s10 + $0x68] sm:$0xff]  ;;  %v713_v55 = vrot.slane %v6278_v57, 1 }
  0x1c   : > { %v6304_v1 = vld [vmem:[%s6165_s10 + $0x78] sm:$0xff]  ;;  %v6306_v2 = vpack.c.bf16 %v4121_v60, %v4120_v59  ;;  %v5505_v3 = vpack.c.bf16 %v3967_v63, %v3966_v62  ;;  %v257_v4 = vld [vmem:[%s6165_s10 + $0x28] sm:$0x3]  ;;  %v6318_v5 = vld [vmem:[%s6165_s10 + $0x80] sm:$0xff]  ;;  %v6451_v54 = vsel %vm692_vm2, %v708_v42, %v709_v43 }
  0x1d   : > { %5492 = vmatpush3.bf16.msra.mxu1 %v5489_v24  ;;  %v1112_v6 = vrot.slane %v257_v4, 2  ;;  %v6321_v8 = vld [vmem:[%s6165_s10 + $0x90] sm:$0xff]  ;;  %v4000_v10 = vld [vmem:[%s8026_s1 + $0x80] sm:$0xff]  ;;  %v4001_v11 = vld [vmem:[%s8026_s1 + $0x88] sm:$0xff]  ;;  %v701_v24 = vrot.slane %v257_v4, 1  ;;  %8108 = vst [vmem:[#allocation16_spill] sm:$0xff] %v6451_v54 }
  0x1e   : > { %5540 = vmatpush3.bf16.msra.mxu0 %v6180_v25  ;;  %5494 = vmatprep.subr.bf16.mxu1 %v5493_v45  ;;  %v6344_v13 = vld [vmem:[%s6165_s10 + $0x98] sm:$0xff]  ;;  %v6347_v14 = vld [vmem:[%s6165_s10 + $0xa8] sm:$0xff]  ;;  %v6351_v15 = vpack.c.bf16 %v4001_v11, %v4000_v10  ;;  %v6360_v16 = vld [vmem:[%s6165_s10 + $0xb0] sm:$0xff]  ;;  %v718_v10 = vrot.slane %v6304_v1, 1  ;;  %v719_v11 = vrot.slane %v6318_v5, 1  ;;  %v723_v42 = vrot.slane %v6321_v8, 1 }
  0x1f   : > { %5542 = vmatprep.subr.bf16.mxu0 %v5541_v30  ;;  %v6329_v9 = vsel %vm1103_vm1, %v1110_v34, %v1112_v6  ;;  %8098 = vst [vmem:[#allocation6_spill] sm:$0xff] %v6347_v14  ;;  %8099 = vst [vmem:[#allocation7_spill] sm:$0xff] %v6360_v16  ;;  %v6366_v20 = vld [vmem:[%s6165_s10 + $0xc0] sm:$0xff]  ;;  %v6375_v21 = vld [vmem:[%s6165_s10 + $0x10] sm:$0x3]  ;;  %v6411_v36 = vsel %vm692_vm2, %v699_v19, %v701_v24 }
  0x20   : > { %4758 = vmatmul.mubr.msk.f32.vlgmr.msra.gmra.mrb[0].mxu1 %vm322_vm0, %v6192_v28  ;;  %8100 = vst [vmem:[#allocation8_spill] sm:$0xff] %v6366_v20  ;;  %v1107_v26 = vrot.slane %v6375_v21, 2  ;;  %v6389_v31 = vld [vmem:[%s6165_s10 + $0x40] sm:$0x3]  ;;  %v4122_v32 = vld [vmem:[%s8026_s1 + $0x150] sm:$0xff]  ;;  %v4123_v34 = vld [vmem:[%s8026_s1 + $0x158] sm:$0xff] }
  0x21   : > { %4950 = vmatmul.mubr.msk.f32.vlgmr.msra.gmra.mrb[0].mxu0 %vm322_vm0, %v6195_v29  ;;  %4760 = vmatprep.mubr.msk.f32.mxu1 %vm322_vm0, %v6174_v23  ;;  %v6380_v23 = vld [vmem:[%s6165_s10 + $0xc8] sm:$0xff]  ;;  %v706_v39 = vrot.slane %v6389_v31, 1  ;;  %v6423_v44 = vld [vmem:[%s6165_s10 + $0x58] sm:$0x3]  ;;  %v4124_v47 = vld [vmem:[%s8026_s1 + $0x160] sm:$0xff] }
  0x22   : > { %5544 = vmatpush3.bf16.msra.mxu0 %v5541_v30  ;;  %4952 = vmatprep.mubr.msk.f32.mxu0 %vm322_vm0, %v6210_v37  ;;  %8101 = vst [vmem:[#allocation9_spill] sm:$0xff] %v6380_v23  ;;  %v704_v30 = vrot.slane %v6243_v46, 1  ;;  %v6402_v35 = vsel %vm1103_vm1, %v1105_v33, %v1107_v26  ;;  %v6438_v50 = vld [vmem:[%s6165_s10 + $0xe0] sm:$0xff]  ;;  %v6447_v52 = vld [vmem:[%s6165_s10 + $0xf0] sm:$0xff]  ;;  %v4127_v62 = vld [vmem:[%s8026_s1 + $0x178] sm:$0xff] }
  0x23   : > { %5546 = vmatprep.subr.bf16.mxu0 %v5545_v38  ;;  %5496 = vmatpush3.bf16.msra.mxu1 %v5493_v45  ;;  %8102 = vst [vmem:[#allocation10_spill] sm:$0xff] %v6402_v35  ;;  %v5561_v45 = vpack.c.bf16 %v4123_v34, %v4122_v32  ;;  %8105 = vst [vmem:[#allocation13_spill] sm:$0xff] %v6438_v50  ;;  %v6456_v59 = vld [vmem:[%s6165_s10 + $0x70] sm:$0x3]  ;;  %v6471_v63 = vld [vmem:[%s6165_s10 + $0xf8] sm:$0xff] }
  0x24   : > { %4761 = vmatmul.mubr.msk.f32.gmra.mrb[2].mxu1 %vm322_vm0, %v6195_v29  ;;  %5498 = vmatprep.subr.bf16.mxu1 %v5497_v53  ;;  %v703_v29 = vrot.slane %v6210_v37, 1  ;;  %v6444_v51 = vsel %vm692_vm2, %v704_v30, %v706_v39  ;;  %8107 = vst [vmem:[#allocation15_spill] sm:$0xff] %v6447_v52  ;;  %8109 = vst [vmem:[#allocation17_spill] sm:$0xff] %v6471_v63  ;;  %v716_v4 = vrot.slane %v6456_v59, 1  ;;  %v6488_v18 = vld [vmem:[%s6165_s10 + $0x88] sm:$0x3] }
  0x25   : > { %4953 = vmatmul.mubr.msk.f32.gmra.mrb[2].mxu0 %vm322_vm0, %v6243_v46  ;;  %4763 = vmatprep.mubr.msk.f32.mxu1 %vm322_vm0, %v6210_v37  ;;  %8106 = vst [vmem:[#allocation14_spill] sm:$0xff] %v6444_v51  ;;  %v4160_v24 = vld [vmem:[%s8026_s1 + $0x180] sm:$0xff]  ;;  %v4161_v26 = vld [vmem:[%s8026_s1 + $0x188] sm:$0xff]  ;;  %v721_v34 = vrot.slane %v6488_v18, 1  ;;  %v6515_v39 = vsel %vm692_vm2, %v718_v10, %v719_v11  ;;  %v6575_v25 = vld [vmem:[%s6165_s10 + $0xd0] sm:$0x3] }
  0x26   : > { %4955 = vmatprep.mubr.msk.f32.mxu0 %vm322_vm0, %v6249_v48  ;;  %5548 = vmatpush3.bf16.msra.mxu0 %v5545_v38  ;;  %v6414_v38 = vld [vmem:[%s6165_s10 + $0xd8] sm:$0xff]  ;;  %v6418_v33 = vsel %vm692_vm2, %v703_v29, %v704_v30  ;;  %v6503_v29 = vld [vmem:[%s6165_s10 + $0x110] sm:$0xff]  ;;  %v6511_v32 = vld [vmem:[%s6165_s10 + $0x120] sm:$0xff]  ;;  %8114 = vst [vmem:[#allocation22_spill] sm:$0xff] %v6515_v39  ;;  %v736_v35 = vrot.slane %v6575_v25, 1 }
  0x27   : > { %5550 = vmatprep.subr.bf16.mxu0 %v5549_v49  ;;  %5500 = vmatpush3.bf16.msra.mxu1 %v5497_v53  ;;  %8103 = vst [vmem:[#allocation11_spill] sm:$0xff] %v6414_v38  ;;  %8104 = vst [vmem:[#allocation12_spill] sm:$0xff] %v6418_v33  ;;  %v711_v53 = vrot.slane %v6423_v44, 1  ;;  %v6558_v10 = vld [vmem:[%s6165_s10 + $0x140] sm:$0xff]  ;;  %v6594_v12 = vld [vmem:[%s6165_s10 + $0x168] sm:$0xff] }
  0x28   : > { %4764 = vmatmul.mubr.msk.f32.gmra.mrb[4].mxu1 %vm322_vm0, %v6243_v46  ;;  %5502 = vmatprep.subr.bf16.mxu1 %v5501_v61  ;;  %8112 = vst [vmem:[#allocation20_spill] sm:$0xff] %v6503_v29  ;;  %8121 = vst [vmem:[#allocation29_spill] sm:$0xff] %v6575_v25  ;;  %v743_v25 = vrot.slane %v6447_v52, 1 }
  0x29   : > { %4956 = vmatmul.mubr.msk.f32.gmra.mrb[4].mxu0 %vm322_vm0, %v6275_v56  ;;  %4766 = vmatprep.mubr.msk.f32.mxu1 %vm322_vm0, %v6249_v48 }
  0x2a   : > { %4958 = vmatprep.mubr.msk.f32.mxu0 %vm322_vm0, %v6278_v57  ;;  %5552 = vmatpush3.bf16.msra.mxu0 %v5549_v49  ;;  %v4125_v49 = vld [vmem:[%s8026_s1 + $0x168] sm:$0xff] }
  0x2b   : > { %5554 = vmatprep.subr.bf16.mxu0 %v5553_v58  ;;  %5504 = vmatpush3.bf16.msra.mxu1 %v5501_v61  ;;  %v5565_v60 = vpack.c.bf16 %v4125_v49, %v4124_v47  ;;  %v4126_v61 = vld [vmem:[%s8026_s1 + $0x170] sm:$0xff]  ;;  %v6522_v47 = vpack.c.bf16 %v4161_v26, %v4160_v24  ;;  %v6531_v49 = vld [vmem:[%s6165_s10 + $0x128] sm:$0xff] }
  0x2c   : > { %4767 = vmatmul.mubr.msk.f32.gmra.mrb[6].mxu1 %vm322_vm0, %v6275_v56  ;;  %5506 = vmatprep.subr.bf16.mxu1 %v5505_v3  ;;  %v5569_v19 = vpack.c.bf16 %v4127_v62, %v4126_v61  ;;  %8115 = vst [vmem:[#allocation23_spill] sm:$0xff] %v6531_v49  ;;  %v728_v61 = vrot.slane %v6347_v14, 1  ;;  %v729_v62 = vrot.slane %v6360_v16, 1 }
  0x2d   : > { %4959 = vmatmul.mubr.msk.f32.gmra.mrb[6].mxu0 %vm322_vm0, %v6301_v0  ;;  %4769 = vmatprep.mubr.msk.f32.mxu1 %vm322_vm0, %v6278_v57 }
  0x2e   : > { %4961 = vmatprep.mubr.msk.f32.mxu0 %vm322_vm0, %v6304_v1  ;;  %5556 = vmatpush3.bf16.msra.mxu0 %v5553_v58  ;;  %v714_v58 = vrot.slane %v6301_v0, 1  ;;  %v6570_v26 = vsel %vm692_vm2, %v728_v61, %v729_v62  ;;  %v694_v61 = vrot.slane %v6192_v28, 1  ;;  %v6612_v28 = vld [vmem:[%s6165_s10 + $0x170] sm:$0xff] }
  0x2f   : > { %5558 = vmatprep.subr.bf16.mxu0 %v6306_v2  ;;  %5508 = vmatpush3.bf16.msra.mxu1 %v5505_v3  ;;  %v6479_v3 = vld [vmem:[%s6165_s10 + $0x108] sm:$0xff]  ;;  %8120 = vst [vmem:[#allocation28_spill] sm:$0xff] %v6570_v26  ;;  %8125 = vst [vmem:[#allocation33_spill] sm:$0xff] %v6612_v28 }
  0x30   : > { %4770 = vmatmul.mubr.msk.f32.gmra.mrb[8].mxu1 %vm322_vm0, %v6301_v0  ;;  %5510 = vmatprep.subr.bf16.mxu1 %v6351_v15  ;;  %v6483_v6 = vsel %vm692_vm2, %v713_v55, %v714_v58  ;;  %v6508_v30 = vsel %vm692_vm2, %v714_v58, %v716_v4  ;;  %v6539_v55 = vld [vmem:[%s6165_s10 + $0x138] sm:$0xff] }
  0x31   : > { %4962 = vmatmul.mubr.msk.f32.gmra.mrb[8].mxu0 %vm322_vm0, %v6318_v5  ;;  %4772 = vmatprep.mubr.msk.f32.mxu1 %vm322_vm0, %v6304_v1  ;;  %8111 = vst [vmem:[#allocation19_spill] sm:$0xff] %v6483_v6  ;;  %8113 = vst [vmem:[#allocation21_spill] sm:$0xff] %v6508_v30  ;;  %v6548_v4 = vld [vmem:[%s6165_s10 + $0xb8] sm:$0x3] }
  0x32   : > { %4964 = vmatprep.mubr.msk.f32.mxu0 %vm322_vm0, %v6321_v8  ;;  %8118 = vst [vmem:[#allocation26_spill] sm:$0xff] %v6548_v4  ;;  %v731_v24 = vrot.slane %v6548_v4, 1  ;;  %v744_v4 = vrot.slane %v6471_v63, 1 }
  0x34   : > { %4773 = vmatmul.mubr.msk.f32.gmra.mrb[10].mxu1 %vm322_vm0, %v6318_v5  ;;  %v6591_v17 = vsel %vm692_vm2, %v729_v62, %v731_v24  ;;  %v696_v62 = vrot.slane %v6375_v21, 1  ;;  %v4002_v21 = vld [vmem:[%s8026_s1 + $0x90] sm:$0xff] }
  0x35   : > { %4965 = vmatmul.mubr.msk.f32.gmra.mrb[10].mxu0 %vm322_vm0, %v6344_v13  ;;  %4775 = vmatprep.mubr.msk.f32.mxu1 %vm322_vm0, %v6321_v8  ;;  %8122 = vst [vmem:[#allocation30_spill] sm:$0xff] %v6591_v17 }
  0x36   : > { %4967 = vmatprep.mubr.msk.f32.mxu0 %vm322_vm0, %v6347_v14 }
  0x38   : > { %4776 = vmatmul.mubr.msk.f32.gmra.mrb[12].mxu1 %vm322_vm0, %v6344_v13 }
  0x39   : > { %4968 = vmatmul.mubr.msk.f32.gmra.mrb[12].mxu0 %vm322_vm0, %v6360_v16  ;;  %4778 = vmatprep.mubr.msk.f32.mxu1 %vm322_vm0, %v6347_v14  ;;  %v6654_v14 = vld [vmem:[%s6165_s10 + $0x118] sm:$0x3] }
  0x3a   : > { %4970 = vmatprep.mubr.msk.f32.mxu0 %vm322_vm0, %v6366_v20 }
  0x3c   : > { %4779 = vmatmul.mubr.msk.f32.gmra.mrb[14].mxu1 %vm322_vm0, %v6360_v16  ;;  %v6628_v16 = vld [vmem:[%s6165_s10 + $0x100] sm:$0x3] }
  0x3d   : > { %4971 = vmatmul.mubr.msk.f32.gmra.mrb[14].mxu0 %vm322_vm0, %v6380_v23  ;;  %4781 = vmatprep.mubr.msk.f32.mxu1 %vm322_vm0, %v6366_v20 }
  0x3e   : > { %5013 = vmatprep.mubr.msk.f32.mxu0 %vm322_vm0, %v6384_v27 }
  0x40   : > { %4782 = vmatmul.mubr.msk.f32.gmra.mrb[16].mxu1 %vm322_vm0, %v6380_v23 }
  0x41   : > { %5014 = vmatmul.mubr.msk.f32.vlgmr.msra.gmra.mrb[0].mxu0 %vm322_vm0, %v6411_v36  ;;  %4784 = vmatprep.mubr.msk.f32.mxu1 %vm322_vm0, %v6414_v38 }
  0x42   : > { %5560 = vmatpush3.bf16.msra.mxu0 %v6306_v2  ;;  %5016 = vmatprep.mubr.msk.f32.mxu0 %vm322_vm0, %v6418_v33  ;;  %v6476_v2 = vsel %vm692_vm2, %v709_v43, %v711_v53  ;;  %v724_v43 = vrot.slane %v6344_v13, 1  ;;  %v6536_v53 = vsel %vm692_vm2, %v719_v11, %v721_v34  ;;  %v733_v34 = vrot.slane %v6366_v20, 1  ;;  %v6603_v20 = vld [vmem:[%s6165_s10 + $0xe8] sm:$0x3] }
  0x43   : > { %5562 = vmatprep.subr.bf16.mxu0 %v5561_v45  ;;  %8110 = vst [vmem:[#allocation18_spill] sm:$0xff] %v6476_v2  ;;  %8116 = vst [vmem:[#allocation24_spill] sm:$0xff] %v6536_v53 }
  0x44   : > { %4785 = vmatmul.mubr.msk.f32.gmra.mrb[18].mxu1 %vm322_vm0, %v6438_v50  ;;  %8124 = vst [vmem:[#allocation32_spill] sm:$0xff] %v6603_v20 }
  0x45   : > { %5017 = vmatmul.mubr.msk.f32.gmra.mrb[2].mxu0 %vm322_vm0, %v6444_v51  ;;  %4787 = vmatprep.mubr.msk.f32.mxu1 %vm322_vm0, %v6447_v52  ;;  %v748_v52 = vrot.slane %v6479_v3, 1 }
  0x46   : > { %5019 = vmatprep.mubr.msk.f32.mxu0 %vm322_vm0, %v6451_v54  ;;  %5564 = vmatpush3.bf16.msra.mxu0 %v5561_v45  ;;  %v6520_v45 = vld [vmem:[%s6165_s10 + $0xa0] sm:$0x3] }
  0x47   : > { %5566 = vmatprep.subr.bf16.mxu0 %v5565_v60  ;;  %v726_v58 = vrot.slane %v6520_v45, 1 }
  0x48   : > { %4788 = vmatmul.mubr.msk.f32.gmra.mrb[20].mxu1 %vm322_vm0, %v6471_v63  ;;  %v6649_v63 = vsel %vm692_vm2, %v743_v25, %v744_v4 }
  0x49   : > { %5020 = vmatmul.mubr.msk.f32.gmra.mrb[4].mxu0 %vm322_vm0, %v6476_v2  ;;  %4790 = vmatprep.mubr.msk.f32.mxu1 %vm322_vm0, %v6479_v3  ;;  %v6563_v11 = vsel %vm692_vm2, %v724_v43, %v726_v58  ;;  %v693_v58 = vrot.slane %v6171_v22, 1  ;;  %v739_v22 = vrot.slane %v6438_v50, 1  ;;  %v741_v50 = vrot.slane %v6603_v20, 1  ;;  %8129 = vst [vmem:[#allocation37_spill] sm:$0xff] %v6649_v63 }
  0x4a   : > { %5022 = vmatprep.mubr.msk.f32.mxu0 %vm322_vm0, %v6483_v6  ;;  %5568 = vmatpush3.bf16.msra.mxu0 %v5565_v60  ;;  %v6543_v60 = vsel %vm692_vm2, %v723_v42, %v724_v43  ;;  %8119 = vst [vmem:[#allocation27_spill] sm:$0xff] %v6563_v11  ;;  %v734_v42 = vrot.slane %v6380_v23, 1  ;;  %v6584_v43 = vld [vmem:[%s6165_s10 + $0x158] sm:$0xff]  ;;  %v738_v23 = vrot.slane %v6414_v38, 1  ;;  %v749_v20 = vrot.slane %v6503_v29, 1 }
  0x4b   : > { %5570 = vmatprep.subr.bf16.mxu0 %v5569_v19  ;;  %8117 = vst [vmem:[#allocation25_spill] sm:$0xff] %v6543_v60 }
  0x4c   : > { %4791 = vmatmul.mubr.msk.f32.gmra.mrb[22].mxu1 %vm322_vm0, %v6503_v29  ;;  %v6598_v41 = vsel %vm692_vm2, %v733_v34, %v734_v42  ;;  %v6618_v24 = vsel %vm692_vm2, %v734_v42, %v736_v35  ;;  %v695_v34 = vsel %vm692_vm2, %v693_v58, %v694_v61  ;;  %v6623_v38 = vsel %vm692_vm2, %v738_v23, %v739_v22  ;;  %v4003_v35 = vld [vmem:[%s8026_s1 + $0x98] sm:$0xff] }
  0x4d   : > { %5023 = vmatmul.mubr.msk.f32.gmra.mrb[6].mxu0 %vm322_vm0, %v6508_v30  ;;  %4793 = vmatprep.mubr.msk.f32.mxu1 %vm322_vm0, %v6511_v32  ;;  %8123 = vst [vmem:[#allocation31_spill] sm:$0xff] %v6598_v41  ;;  %8126 = vst [vmem:[#allocation34_spill] sm:$0xff] %v6618_v24  ;;  %v697_v23 = vsel %vm692_vm2, %v694_v61, %v696_v62  ;;  %v6645_v42 = vsel %vm692_vm2, %v739_v22, %v741_v50  ;;  %v746_v58 = vrot.slane %v6628_v16, 1  ;;  %v4004_v50 = vld [vmem:[%s8026_s1 + $0xa0] sm:$0xff]  ;;  %v4005_v61 = vld [vmem:[%s8026_s1 + $0xa8] sm:$0xff] }
  0x4e   : > { %5025 = vmatprep.mubr.msk.f32.mxu0 %vm322_vm0, %v6515_v39  ;;  %5572 = vmatpush3.bf16.msra.mxu0 %v5569_v19  ;;  %v6566_v19 = vld [vmem:[%s6165_s10 + $0x150] sm:$0xff]  ;;  %8127 = vst [vmem:[#allocation35_spill] sm:$0xff] %v6623_v38  ;;  %8128 = vst [vmem:[#allocation36_spill] sm:$0xff] %v6645_v42  ;;  %v751_v22 = vrot.slane %v6654_v14, 1  ;;  %v6675_v62 = vsel %vm692_vm2, %v748_v52, %v749_v20 }
  0x4f   : > { %5574 = vmatprep.subr.bf16.mxu0 %v6522_v47  ;;  %v6670_v25 = vsel %vm692_vm2, %v744_v4, %v746_v58  ;;  %8131 = vst [vmem:[#allocation39_spill] sm:$0xff] %v6675_v62  ;;  %v4006_v4 = vld [vmem:[%s8026_s1 + $0xb0] sm:$0xff] }
  0x50   : > { %4794 = vmatmul.mubr.msk.f32.gmra.mrb[24].mxu1 %vm322_vm0, %v6531_v49  ;;  %8130 = vst [vmem:[#allocation38_spill] sm:$0xff] %v6670_v25  ;;  %v6697_v52 = vsel %vm692_vm2, %v749_v20, %v751_v22 }
  0x51   : > { %5026 = vmatmul.mubr.msk.f32.gmra.mrb[8].mxu0 %vm322_vm0, %v6536_v53  ;;  %4796 = vmatprep.mubr.msk.f32.mxu1 %vm322_vm0, %v6539_v55  ;;  %8132 = vst [vmem:[#allocation40_spill] sm:$0xff] %v6697_v52 }
  0x52   : > { %5028 = vmatprep.mubr.msk.f32.mxu0 %vm322_vm0, %v6543_v60 }
  0x54   : > { %4797 = vmatmul.mubr.msk.f32.gmra.mrb[26].mxu1 %vm322_vm0, %v6558_v10 }
  0x55   : > { %5029 = vmatmul.mubr.msk.f32.gmra.mrb[10].mxu0 %vm322_vm0, %v6563_v11  ;;  %4799 = vmatprep.mubr.msk.f32.mxu1 %vm322_vm0, %v6566_v19 }
  0x56   : > { %5031 = vmatprep.mubr.msk.f32.mxu0 %vm322_vm0, %v6570_v26 }
  0x58   : > { %4800 = vmatmul.mubr.msk.f32.gmra.mrb[28].mxu1 %vm322_vm0, %v6584_v43 }
  0x59   : > { %5032 = vmatmul.mubr.msk.f32.gmra.mrb[12].mxu0 %vm322_vm0, %v6591_v17  ;;  %4802 = vmatprep.mubr.msk.f32.mxu1 %vm322_vm0, %v6594_v12 }
  0x5a   : > { %5034 = vmatprep.mubr.msk.f32.mxu0 %vm322_vm0, %v6598_v41 }
  0x5c   : > { %4803 = vmatmul.mubr.msk.f32.gmra.mrb[30].mxu1 %vm322_vm0, %v6612_v28 }
  0x5d   : > { %5035 = vmatmul.mubr.msk.f32.gmra.mrb[14].mxu0 %vm322_vm0, %v6618_v24  ;;  %4821 = vmatprep.mubr.msk.f32.mxu1 %vm322_vm0, %v695_v34  ;;  %v5513_v34 = vpack.c.bf16 %v4003_v35, %v4002_v21  ;;  %v753_v21 = vrot.slane %v6511_v32, 1  ;;  %v754_v35 = vrot.slane %v6531_v49, 1  ;;  %v6706_v49 = vld [vmem:[%s6165_s10 + $0x148] sm:$0x3] }
  0x5e   : > { %5037 = vmatprep.mubr.msk.f32.mxu0 %vm322_vm0, %v6623_v38 }
  0x5f   : > { %v6701_v58 = vsel %vm692_vm2, %v753_v21, %v754_v35  ;;  %v763_v21 = vrot.slane %v6566_v19, 1 }
  0x60   : > { %4822 = vmatmul.mubr.msk.f32.vlgmr.msra.gmra.mrb[0].mxu1 %vm322_vm0, %v697_v23  ;;  %v6680_v23 = vld [vmem:[%s6165_s10 + $0x130] sm:$0x3]  ;;  %8133 = vst [vmem:[#allocation41_spill] sm:$0xff] %v6701_v58 }
  0x61   : > { %5038 = vmatmul.mubr.msk.f32.gmra.mrb[16].mxu0 %vm322_vm0, %v6645_v42  ;;  %4824 = vmatprep.mubr.msk.f32.mxu1 %vm322_vm0, %v6384_v27  ;;  %v5517_v27 = vpack.c.bf16 %v4005_v61, %v4004_v50  ;;  %v758_v50 = vrot.slane %v6539_v55, 1  ;;  %v759_v61 = vrot.slane %v6558_v10, 1 }
  0x62   : > { %5040 = vmatprep.mubr.msk.f32.mxu0 %vm322_vm0, %v6649_v63  ;;  %5512 = vmatpush3.bf16.msra.mxu1 %v6351_v15  ;;  %v4007_v15 = vld [vmem:[%s8026_s1 + $0xb8] sm:$0xff] }
  0x63   : > { %5514 = vmatprep.subr.bf16.mxu1 %v5513_v34  ;;  %v6721_v22 = vsel %vm692_vm2, %v758_v50, %v759_v61  ;;  %v768_v50 = vrot.slane %v6594_v12, 1 }
  0x64   : > { %4825 = vmatmul.mubr.msk.f32.gmra.mrb[2].mxu1 %vm322_vm0, %v6411_v36  ;;  %v756_v36 = vrot.slane %v6680_v23, 1  ;;  %8135 = vst [vmem:[#allocation43_spill] sm:$0xff] %v6721_v22 }
  0x65   : > { %5041 = vmatmul.mubr.msk.f32.gmra.mrb[18].mxu0 %vm322_vm0, %v6670_v25  ;;  %4827 = vmatprep.mubr.msk.f32.mxu1 %vm322_vm0, %v6418_v33  ;;  %v5521_v33 = vpack.c.bf16 %v4007_v15, %v4006_v4  ;;  %v764_v4 = vrot.slane %v6584_v43, 1  ;;  %v6726_v15 = vld [vmem:[%s6165_s10 + $0x160] sm:$0x3] }
  0x66   : > { %5043 = vmatprep.mubr.msk.f32.mxu0 %vm322_vm0, %v6675_v62  ;;  %5516 = vmatpush3.bf16.msra.mxu1 %v5513_v34  ;;  %v6717_v20 = vsel %vm692_vm2, %v754_v35, %v756_v36  ;;  %v761_v34 = vrot.slane %v6706_v49, 1 }
  0x67   : > { %5518 = vmatprep.subr.bf16.mxu1 %v5517_v27  ;;  %8134 = vst [vmem:[#allocation42_spill] sm:$0xff] %v6717_v20  ;;  %v6741_v36 = vsel %vm692_vm2, %v763_v21, %v764_v4 }
  0x68   : > { %4828 = vmatmul.mubr.msk.f32.gmra.mrb[4].mxu1 %vm322_vm0, %v6444_v51  ;;  %v6737_v35 = vsel %vm692_vm2, %v759_v61, %v761_v34  ;;  %8137 = vst [vmem:[#allocation45_spill] sm:$0xff] %v6741_v36  ;;  %v6752_v61 = vld [vmem:[%s6165_s10 + $0x180] sm:$0xff]  ;;  %v6755_v34 = vld [vmem:[%s6165_s10 + $0x188] sm:$0xff] }
  0x69   : > { %5044 = vmatmul.mubr.msk.f32.gmra.mrb[20].mxu0 %vm322_vm0, %v6697_v52  ;;  %4830 = vmatprep.mubr.msk.f32.mxu1 %vm322_vm0, %v6451_v54  ;;  %8136 = vst [vmem:[#allocation44_spill] sm:$0xff] %v6737_v35  ;;  %v6746_v54 = vld [vmem:[%s6165_s10 + $0x178] sm:$0x3]  ;;  %v1788_v51 = vrot.slane %v6755_v34, 1 }
  0x6a   : > { %5046 = vmatprep.mubr.msk.f32.mxu0 %vm322_vm0, %v6701_v58  ;;  %5520 = vmatpush3.bf16.msra.mxu1 %v5517_v27  ;;  %v766_v27 = vrot.slane %v6726_v15, 1  ;;  %v771_v21 = vrot.slane %v6746_v54, 1 }
  0x6b   : > { %5522 = vmatprep.subr.bf16.mxu1 %v5521_v33 }
  0x6c   : > { %4831 = vmatmul.mubr.msk.f32.gmra.mrb[6].mxu1 %vm322_vm0, %v6476_v2  ;;  %v769_v2 = vrot.slane %v6612_v28, 1  ;;  %v6773_v28 = vld [vmem:[%s6165_s10 + $0x190] sm:$0x3] }
  0x6d   : > { %5047 = vmatmul.mubr.msk.f32.gmra.mrb[22].mxu0 %vm322_vm0, %v6717_v20  ;;  %4833 = vmatprep.mubr.msk.f32.mxu1 %vm322_vm0, %v6483_v6  ;;  %v1787_v6 = vrot.slane %v6752_v61, 1 }
  0x6e   : > { %5049 = vmatprep.mubr.msk.f32.mxu0 %vm322_vm0, %v6721_v22  ;;  %5524 = vmatpush3.bf16.msra.mxu1 %v5521_v33  ;;  %v6764_v33 = vsel %vm692_vm2, %v764_v4, %v766_v27  ;;  %v6784_v4 = vsel %vm692_vm2, %v769_v2, %v771_v21  ;;  %v1790_v27 = vrot.slane %v6773_v28, 1  ;;  %v1114_v21 = vrot.slane %v6210_v37, 2 }
  0x6f   : > { %5685 = vmatprep.subr.bf16.mxu1 %v6123_v7  ;;  %8138 = vst [vmem:[#allocation46_spill] sm:$0xff] %v6764_v33  ;;  %8140 = vst [vmem:[#allocation48_spill] sm:$0xff] %v6784_v4 }
  0x70   : > { %4834 = vmatmul.mubr.msk.f32.gmra.mrb[8].mxu1 %vm322_vm0, %v6508_v30  ;;  %v6768_v30 = vsel %vm692_vm2, %v768_v50, %v769_v2  ;;  %v6788_v50 = vsel %vm692_vm2, %v1787_v6, %v1788_v51  ;;  %v6799_v2 = vsel %vm692_vm2, %v1788_v51, %v1790_v27  ;;  %v1115_v6 = vrot.slane %v6243_v46, 2 }
  0x71   : > { %5050 = vmatmul.mubr.msk.f32.gmra.mrb[24].mxu0 %vm322_vm0, %v6737_v35  ;;  %4836 = vmatprep.mubr.msk.f32.mxu1 %vm322_vm0, %v6515_v39  ;;  %8139 = vst [vmem:[#allocation47_spill] sm:$0xff] %v6768_v30  ;;  %8141 = vst [vmem:[#allocation49_spill] sm:$0xff] %v6788_v50  ;;  %v1117_v51 = vrot.slane %v6389_v31, 2 }
  0x72   : > { %5052 = vmatprep.mubr.msk.f32.mxu0 %vm322_vm0, %v6741_v36  ;;  %8142 = vst [vmem:[#allocation50_spill] sm:$0xff] %v6799_v2  ;;  %v6819_v27 = vsel %vm1103_vm1, %v1114_v21, %v1115_v6  ;;  %v1124_v21 = vrot.slane %v6278_v57, 2 }
  0x73   : > { %v6839_v31 = vsel %vm1103_vm1, %v1115_v6, %v1117_v51  ;;  %v1129_v6 = vrot.slane %v6304_v1, 2  ;;  %v1130_v51 = vrot.slane %v6318_v5, 2 }
  0x74   : > { %4837 = vmatmul.mubr.msk.f32.gmra.mrb[10].mxu1 %vm322_vm0, %v6536_v53 }
  0x75   : > { %5053 = vmatmul.mubr.msk.f32.gmra.mrb[26].mxu0 %vm322_vm0, %v6764_v33  ;;  %4839 = vmatprep.mubr.msk.f32.mxu1 %vm322_vm0, %v6543_v60 }
  0x76   : > { %5055 = vmatprep.mubr.msk.f32.mxu0 %vm322_vm0, %v6768_v30 }
  0x78   : > { %4840 = vmatmul.mubr.msk.f32.gmra.mrb[12].mxu1 %vm322_vm0, %v6563_v11  ;;  %v4162_v11 = vld [vmem:[%s8026_s1 + $0x190] sm:$0xff] }
  0x79   : > { %5056 = vmatmul.mubr.msk.f32.gmra.mrb[28].mxu0 %vm322_vm0, %v6784_v4  ;;  %4842 = vmatprep.mubr.msk.f32.mxu1 %vm322_vm0, %v6570_v26  ;;  %v4163_v26 = vld [vmem:[%s8026_s1 + $0x198] sm:$0xff] }
  0x7a   : > { %5058 = vmatprep.mubr.msk.f32.mxu0 %vm322_vm0, %v6788_v50  ;;  %v1119_v50 = vrot.slane %v6249_v48, 2  ;;  %v5577_v60 = vpack.c.bf16 %v4163_v26, %v4162_v11  ;;  %v1122_v11 = vrot.slane %v6423_v44, 2  ;;  %v4167_v44 = vld [vmem:[%s8026_s1 + $0x1b8] sm:$0xff] }
  0x7c   : > { %4843 = vmatmul.mubr.msk.f32.gmra.mrb[14].mxu1 %vm322_vm0, %v6591_v17  ;;  %v1120_v17 = vrot.slane %v6275_v56, 2 }
  0x7d   : > { %5059 = vmatmul.mubr.msk.f32.gmra.mrb[30].mxu0 %vm322_vm0, %v6799_v2  ;;  %4845 = vmatprep.mubr.msk.f32.mxu1 %vm322_vm0, %v6598_v41  ;;  %v4164_v2 = vld [vmem:[%s8026_s1 + $0x1a0] sm:$0xff]  ;;  %v4165_v41 = vld [vmem:[%s8026_s1 + $0x1a8] sm:$0xff] }
  0x7e   : > { %5077 = vmatprep.mubr.msk.f32.mxu0 %vm322_vm0, %v6218_v40  ;;  %v6843_v26 = vsel %vm1103_vm1, %v1119_v50, %v1120_v17  ;;  %v5581_v53 = vpack.c.bf16 %v4165_v41, %v4164_v2  ;;  %v6862_v41 = vsel %vm1103_vm1, %v1120_v17, %v1122_v11  ;;  %v1127_v50 = vrot.slane %v6456_v59, 2  ;;  %v4200_v17 = vld [vmem:[%s8026_s1 + $0x1c0] sm:$0xff]  ;;  %v4201_v59 = vld [vmem:[%s8026_s1 + $0x1c8] sm:$0xff] }
  0x7f   : > { %8143 = vst [vmem:[#allocation51_spill] sm:$0xff] %v6862_v41  ;;  %v1132_v11 = vrot.slane %v6488_v18, 2 }
  0x80   : > { %4846 = vmatmul.mubr.msk.f32.gmra.mrb[16].mxu1 %vm322_vm0, %v6618_v24  ;;  %v1125_v24 = vrot.slane %v6301_v0, 2 }
  0x81   : > { %5078 = vmatmul.mubr.msk.f32.vlgmr.msra.gmra.mrb[0].mxu0 %vm322_vm0, %v6329_v9  ;;  %4848 = vmatprep.mubr.msk.f32.mxu1 %vm322_vm0, %v6623_v38  ;;  %v6904_v18 = vsel %vm1103_vm1, %v1130_v51, %v1132_v11 }
  0x82   : > { %5576 = vmatpush3.bf16.msra.mxu0 %v6522_v47  ;;  %5080 = vmatprep.mubr.msk.f32.mxu0 %vm322_vm0, %v6819_v27  ;;  %v4166_v47 = vld [vmem:[%s8026_s1 + $0x1b0] sm:$0xff]  ;;  %v6866_v2 = vsel %vm1103_vm1, %v1124_v21, %v1125_v24  ;;  %v6889_v21 = vsel %vm1103_vm1, %v1129_v6, %v1130_v51 }
  0x83   : > { %5578 = vmatprep.subr.bf16.mxu0 %v5577_v60 }
  0x84   : > { %4849 = vmatmul.mubr.msk.f32.gmra.mrb[18].mxu1 %vm322_vm0, %v6645_v42  ;;  %v5585_v42 = vpack.c.bf16 %v4167_v44, %v4166_v47  ;;  %v1134_v47 = vrot.slane %v6321_v8, 2  ;;  %v1135_v44 = vrot.slane %v6344_v13, 2 }
  0x85   : > { %5081 = vmatmul.mubr.msk.f32.gmra.mrb[2].mxu0 %vm322_vm0, %v6839_v31  ;;  %4851 = vmatprep.mubr.msk.f32.mxu1 %vm322_vm0, %v6649_v63 }
  0x86   : > { %5083 = vmatprep.mubr.msk.f32.mxu0 %vm322_vm0, %v6843_v26  ;;  %5580 = vmatpush3.bf16.msra.mxu0 %v5577_v60  ;;  %v6885_v60 = vsel %vm1103_vm1, %v1125_v24, %v1127_v50  ;;  %v6908_v24 = vsel %vm1103_vm1, %v1134_v47, %v1135_v44  ;;  %v8144_v50 = vld [vmem:[#allocation6_spill] sm:$0xff]  ;;  %v8147_v47 = vld [vmem:[#allocation8_spill] sm:$0xff] }
  0x87   : > { %5582 = vmatprep.subr.bf16.mxu0 %v5581_v53  ;;  %v1139_v6 = vrot.slane %v8144_v50, 2 }
  0x88   : > { %4852 = vmatmul.mubr.msk.f32.gmra.mrb[20].mxu1 %vm322_vm0, %v6670_v25  ;;  %v6893_v25 = vpack.c.bf16 %v4201_v59, %v4200_v17  ;;  %v8145_v17 = vld [vmem:[#allocation7_spill] sm:$0xff] }
  0x89   : > { %5084 = vmatmul.mubr.msk.f32.gmra.mrb[4].mxu0 %vm322_vm0, %v6862_v41  ;;  %4854 = vmatprep.mubr.msk.f32.mxu1 %vm322_vm0, %v6675_v62  ;;  %v1140_v59 = vrot.slane %v8145_v17, 2 }
  0x8a   : > { %5086 = vmatprep.mubr.msk.f32.mxu0 %vm322_vm0, %v6866_v2  ;;  %5584 = vmatpush3.bf16.msra.mxu0 %v5581_v53  ;;  %v1137_v53 = vrot.slane %v6520_v45, 2 }
  0x8b   : > { %5586 = vmatprep.subr.bf16.mxu0 %v5585_v42  ;;  %v6926_v11 = vsel %vm1103_vm1, %v1139_v6, %v1140_v59 }
  0x8c   : > { %4855 = vmatmul.mubr.msk.f32.gmra.mrb[22].mxu1 %vm322_vm0, %v6697_v52  ;;  %v6922_v45 = vsel %vm1103_vm1, %v1135_v44, %v1137_v53  ;;  %v8149_v53 = vld [vmem:[#allocation29_spill] sm:$0xff] }
  0x8d   : > { %5087 = vmatmul.mubr.msk.f32.gmra.mrb[6].mxu0 %vm322_vm0, %v6885_v60  ;;  %4857 = vmatprep.mubr.msk.f32.mxu1 %vm322_vm0, %v6701_v58  ;;  %v1144_v58 = vrot.slane %v8147_v47, 2  ;;  %v1147_v6 = vrot.slane %v8149_v53, 2 }
  0x8e   : > { %5089 = vmatprep.mubr.msk.f32.mxu0 %vm322_vm0, %v6889_v21  ;;  %5588 = vmatpush3.bf16.msra.mxu0 %v5585_v42  ;;  %v8146_v42 = vld [vmem:[#allocation26_spill] sm:$0xff] }
  0x8f   : > { %5590 = vmatprep.subr.bf16.mxu0 %v6893_v25  ;;  %v1142_v51 = vrot.slane %v8146_v42, 2 }
  0x90   : > { %4858 = vmatmul.mubr.msk.f32.gmra.mrb[24].mxu1 %vm322_vm0, %v6717_v20  ;;  %v8148_v20 = vld [vmem:[#allocation9_spill] sm:$0xff] }
  0x91   : > { %5090 = vmatmul.mubr.msk.f32.gmra.mrb[8].mxu0 %vm322_vm0, %v6904_v18  ;;  %4860 = vmatprep.mubr.msk.f32.mxu1 %vm322_vm0, %v6721_v22  ;;  %v1145_v52 = vrot.slane %v8148_v20, 2  ;;  %v6939_v44 = vsel %vm1103_vm1, %v1140_v59, %v1142_v51  ;;  %v8150_v22 = vld [vmem:[#allocation11_spill] sm:$0xff] }
  0x92   : > { %5092 = vmatprep.mubr.msk.f32.mxu0 %vm322_vm0, %v6908_v24  ;;  %v1149_v62 = vrot.slane %v8150_v22, 2 }
  0x93   : > { %v6943_v42 = vsel %vm1103_vm1, %v1144_v58, %v1145_v52  ;;  %v6956_v59 = vsel %vm1103_vm1, %v1145_v52, %v1147_v6  ;;  %v8152_v58 = vld [vmem:[#allocation32_spill] sm:$0xff] }
  0x94   : > { %4861 = vmatmul.mubr.msk.f32.gmra.mrb[26].mxu1 %vm322_vm0, %v6737_v35  ;;  %v8151_v35 = vld [vmem:[#allocation13_spill] sm:$0xff]  ;;  %v1152_v51 = vrot.slane %v8152_v58, 2  ;;  %v1159_v58 = vrot.slane %v6479_v3, 2 }
  0x95   : > { %5093 = vmatmul.mubr.msk.f32.gmra.mrb[10].mxu0 %vm322_vm0, %v6922_v45  ;;  %4863 = vmatprep.mubr.msk.f32.mxu1 %vm322_vm0, %v6741_v36  ;;  %v1150_v63 = vrot.slane %v8151_v35, 2  ;;  %v8153_v36 = vld [vmem:[#allocation15_spill] sm:$0xff] }
  0x96   : > { %5095 = vmatprep.mubr.msk.f32.mxu0 %vm322_vm0, %v6926_v11  ;;  %v1154_v38 = vrot.slane %v8153_v36, 2 }
  0x97   : > { %v6960_v53 = vsel %vm1103_vm1, %v1149_v62, %v1150_v63  ;;  %v6973_v52 = vsel %vm1103_vm1, %v1150_v63, %v1152_v51  ;;  %v1157_v62 = vrot.slane %v6628_v16, 2 }
  0x98   : > { %4864 = vmatmul.mubr.msk.f32.gmra.mrb[28].mxu1 %vm322_vm0, %v6764_v33  ;;  %v8154_v33 = vld [vmem:[#allocation17_spill] sm:$0xff] }
  0x99   : > { %5096 = vmatmul.mubr.msk.f32.gmra.mrb[12].mxu0 %vm322_vm0, %v6939_v44  ;;  %4866 = vmatprep.mubr.msk.f32.mxu1 %vm322_vm0, %v6768_v30  ;;  %v1155_v39 = vrot.slane %v8154_v33, 2  ;;  %v8155_v30 = vld [vmem:[#allocation5_spill] sm:$0xff]  ;;  %v8156_v33 = vld [vmem:[#allocation10_spill] sm:$0xff] }
  0x9a   : > { %5098 = vmatprep.mubr.msk.f32.mxu0 %vm322_vm0, %v6943_v42 }
  0x9b   : > { %v6977_v6 = vsel %vm1103_vm1, %v1154_v38, %v1155_v39  ;;  %v6990_v16 = vsel %vm1103_vm1, %v1155_v39, %v1157_v62  ;;  %v1162_v38 = vrot.slane %v6654_v14, 2  ;;  %v1170_v39 = vrot.slane %v6558_v10, 2  ;;  %v8159_v62 = vld [vmem:[#allocation3_spill] sm:$0xff] }
  0x9c   : > { %4867 = vmatmul.mubr.msk.f32.gmra.mrb[30].mxu1 %vm322_vm0, %v6784_v4  ;;  %v1160_v4 = vrot.slane %v6503_v29, 2  ;;  %v8158_v29 = vld [vmem:[#allocation2_spill] sm:$0xff] }
  0x9d   : > { %5099 = vmatmul.mubr.msk.f32.gmra.mrb[14].mxu0 %vm322_vm0, %v6956_v59  ;;  %4885 = vmatprep.mubr.msk.f32.mxu1 %vm322_vm0, %v8155_v30  ;;  %v1164_v30 = vrot.slane %v6511_v32, 2 }
  0x9e   : > { %5101 = vmatprep.mubr.msk.f32.mxu0 %vm322_vm0, %v6960_v53  ;;  %v6995_v63 = vsel %vm1103_vm1, %v1159_v58, %v1160_v4  ;;  %v1174_v58 = vrot.slane %v6566_v19, 2 }
  0xa0   : > { %4886 = vmatmul.mubr.msk.f32.vlgmr.msra.gmra.mrb[0].mxu1 %vm322_vm0, %v8156_v33  ;;  %v8157_v33 = vld [vmem:[#allocation23_spill] sm:$0xff] }
  0xa1   : > { %5102 = vmatmul.mubr.msk.f32.gmra.mrb[16].mxu0 %vm322_vm0, %v6973_v52  ;;  %4888 = vmatprep.mubr.msk.f32.mxu1 %vm322_vm0, %v6218_v40  ;;  %v1165_v51 = vrot.slane %v8157_v33, 2  ;;  %v1167_v40 = vrot.slane %v6680_v23, 2  ;;  %v1172_v23 = vrot.slane %v6706_v49, 2 }
  0xa2   : > { %5104 = vmatprep.mubr.msk.f32.mxu0 %vm322_vm0, %v6977_v6  ;;  %5689 = vmatpush3.bf16.msra.mxu1 %v6123_v7  ;;  %v7009_v7 = vsel %vm1103_vm1, %v1160_v4, %v1162_v38  ;;  %v1175_v38 = vrot.slane %v6584_v43, 2 }
  0xa3   : > { %5686 = vmatprep.subr.bf16.mxu1 %v8158_v29  ;;  %v7014_v14 = vsel %vm1103_vm1, %v1164_v30, %v1165_v51  ;;  %v8160_v30 = vld [vmem:[#allocation4_spill] sm:$0xff]  ;;  %v7047_v49 = vsel %vm1103_vm1, %v1170_v39, %v1172_v23 }
  0xa4   : > { %4889 = vmatmul.mubr.msk.f32.gmra.mrb[2].mxu1 %vm322_vm0, %v6329_v9  ;;  %v1169_v9 = vrot.slane %v6539_v55, 2 }
  0xa5   : > { %5105 = vmatmul.mubr.msk.f32.gmra.mrb[18].mxu0 %vm322_vm0, %v6990_v16  ;;  %4891 = vmatprep.mubr.msk.f32.mxu1 %vm322_vm0, %v6819_v27 }
  0xa6   : > { %5107 = vmatprep.mubr.msk.f32.mxu0 %vm322_vm0, %v6995_v63  ;;  %5690 = vmatpush3.bf16.msra.mxu1 %v8158_v29  ;;  %v7028_v29 = vsel %vm1103_vm1, %v1165_v51, %v1167_v40  ;;  %v7033_v4 = vsel %vm1103_vm1, %v1169_v9, %v1170_v39  ;;  %v1177_v51 = vrot.slane %v6726_v15, 2  ;;  %v7052_v40 = vsel %vm1103_vm1, %v1174_v58, %v1175_v38 }
  0xa7   : > { %5687 = vmatprep.subr.bf16.mxu1 %v8159_v62  ;;  %v1179_v9 = vrot.slane %v6594_v12, 2  ;;  %v1182_v39 = vrot.slane %v6746_v54, 2  ;;  %v2062_v58 = vrot.slane %v6752_v61, 2 }
  0xa8   : > { %4892 = vmatmul.mubr.msk.f32.gmra.mrb[4].mxu1 %vm322_vm0, %v6839_v31  ;;  %v7065_v15 = vsel %vm1103_vm1, %v1175_v38, %v1177_v51  ;;  %v2065_v38 = vrot.slane %v6773_v28, 2  ;;  %v4202_v28 = vld [vmem:[%s8026_s1 + $0x1d0] sm:$0xff] }
  0xa9   : > { %5108 = vmatmul.mubr.msk.f32.gmra.mrb[20].mxu0 %vm322_vm0, %v7009_v7  ;;  %4894 = vmatprep.mubr.msk.f32.mxu1 %vm322_vm0, %v6843_v26 }
  0xaa   : > { %5110 = vmatprep.mubr.msk.f32.mxu0 %vm322_vm0, %v7014_v14  ;;  %5691 = vmatpush3.bf16.msra.mxu1 %v8159_v62  ;;  %v8161_v62 = vld [vmem:[#allocation33_spill] sm:$0xff] }
  0xab   : > { %5688 = vmatprep.subr.bf16.mxu1 %v8160_v30 }
  0xac   : > { %4895 = vmatmul.mubr.msk.f32.gmra.mrb[6].mxu1 %vm322_vm0, %v6862_v41  ;;  %v1180_v41 = vrot.slane %v8161_v62, 2 }
  0xad   : > { %5111 = vmatmul.mubr.msk.f32.gmra.mrb[22].mxu0 %vm322_vm0, %v7028_v29  ;;  %4897 = vmatprep.mubr.msk.f32.mxu1 %vm322_vm0, %v6866_v2 }
  0xae   : > { %5113 = vmatprep.mubr.msk.f32.mxu0 %vm322_vm0, %v7033_v4  ;;  %5692 = vmatpush3.bf16.msra.mxu1 %v8160_v30  ;;  %v7069_v23 = vsel %vm1103_vm1, %v1179_v9, %v1180_v41  ;;  %v2063_v30 = vrot.slane %v6755_v34, 2  ;;  %v7082_v54 = vsel %vm1103_vm1, %v1180_v41, %v1182_v39  ;;  %v4203_v9 = vld [vmem:[%s8026_s1 + $0x1d8] sm:$0xff] }
  0xaf   : > { %v5593_v39 = vpack.c.bf16 %v4203_v9, %v4202_v28  ;;  %v8174_v28 = vld [vmem:[#allocation28_spill] sm:$0xff]  ;;  %v8175_v9 = vld [vmem:[#allocation30_spill] sm:$0xff] }
  0xb0   : > { %4898 = vmatmul.mubr.msk.f32.gmra.mrb[8].mxu1 %vm322_vm0, %v6885_v60  ;;  %v7086_v51 = vsel %vm1103_vm1, %v2062_v58, %v2063_v30  ;;  %v7097_v41 = vsel %vm1103_vm1, %v2063_v30, %v2065_v38  ;;  %v4204_v58 = vld [vmem:[%s8026_s1 + $0x1e0] sm:$0xff]  ;;  %v4205_v30 = vld [vmem:[%s8026_s1 + $0x1e8] sm:$0xff]  ;;  %v4206_v38 = vld [vmem:[%s8026_s1 + $0x1f0] sm:$0xff] }
  0xb1   : > { %5114 = vmatmul.mubr.msk.f32.gmra.mrb[24].mxu0 %vm322_vm0, %v7047_v49  ;;  %4900 = vmatprep.mubr.msk.f32.mxu1 %vm322_vm0, %v6889_v21 }
  0xb2   : > { %5116 = vmatprep.mubr.msk.f32.mxu0 %vm322_vm0, %v7052_v40 }
  0xb4   : > { %4901 = vmatmul.mubr.msk.f32.gmra.mrb[10].mxu1 %vm322_vm0, %v6904_v18 }
  0xb5   : > { %5117 = vmatmul.mubr.msk.f32.gmra.mrb[26].mxu0 %vm322_vm0, %v7065_v15  ;;  %4903 = vmatprep.mubr.msk.f32.mxu1 %vm322_vm0, %v6908_v24 }
  0xb6   : > { %5119 = vmatprep.mubr.msk.f32.mxu0 %vm322_vm0, %v7069_v23 }
  0xb8   : > { %4904 = vmatmul.mubr.msk.f32.gmra.mrb[12].mxu1 %vm322_vm0, %v6922_v45 }
  0xb9   : > { %5120 = vmatmul.mubr.msk.f32.gmra.mrb[28].mxu0 %vm322_vm0, %v7082_v54  ;;  %4906 = vmatprep.mubr.msk.f32.mxu1 %vm322_vm0, %v6926_v11 }
  0xba   : > { %5122 = vmatprep.mubr.msk.f32.mxu0 %vm322_vm0, %v7086_v51 }
  0xbc   : > { %4907 = vmatmul.mubr.msk.f32.gmra.mrb[14].mxu1 %vm322_vm0, %v6939_v44 }
  0xbd   : > { %5123 = vmatmul.mubr.msk.f32.gmra.mrb[30].mxu0 %vm322_vm0, %v7097_v41  ;;  %4909 = vmatprep.mubr.msk.f32.mxu1 %vm322_vm0, %v6943_v42 }
  0xbe   : > { %5141 = vmatprep.mubr.msk.f32.mxu0 %vm322_vm0, %v6210_v37  ;;  %v5597_v37 = vpack.c.bf16 %v4205_v30, %v4204_v58  ;;  %v8177_v58 = vld [vmem:[#allocation34_spill] sm:$0xff]  ;;  %v8178_v30 = vld [vmem:[#allocation35_spill] sm:$0xff] }
  0xc0   : > { %4910 = vmatmul.mubr.msk.f32.gmra.mrb[16].mxu1 %vm322_vm0, %v6956_v59 }
  0xc1   : > { %5142 = vmatmul.mubr.msk.f32.vlgmr.msra.gmra.mrb[0].mxu0 %vm322_vm0, %v6243_v46  ;;  %4912 = vmatprep.mubr.msk.f32.mxu1 %vm322_vm0, %v6960_v53  ;;  %v4207_v46 = vld [vmem:[%s8026_s1 + $0x1f8] sm:$0xff] }
  0xc2   : > { %5592 = vmatpush3.bf16.msra.mxu0 %v6893_v25  ;;  %5144 = vmatprep.mubr.msk.f32.mxu0 %vm322_vm0, %v6249_v48  ;;  %v5601_v48 = vpack.c.bf16 %v4207_v46, %v4206_v38  ;;  %v4240_v25 = vld [vmem:[%s8026_s1 + $0x200] sm:$0xff]  ;;  %v8180_v38 = vld [vmem:[#allocation37_spill] sm:$0xff] }
  0xc3   : > { %5594 = vmatprep.subr.bf16.mxu0 %v5593_v39  ;;  %v8181_v46 = vld [vmem:[#allocation38_spill] sm:$0xff] }
  0xc4   : > { %4913 = vmatmul.mubr.msk.f32.gmra.mrb[18].mxu1 %vm322_vm0, %v6973_v52 }
  0xc5   : > { %5145 = vmatmul.mubr.msk.f32.gmra.mrb[2].mxu0 %vm322_vm0, %v6275_v56  ;;  %4915 = vmatprep.mubr.msk.f32.mxu1 %vm322_vm0, %v6977_v6  ;;  %v4241_v56 = vld [vmem:[%s8026_s1 + $0x208] sm:$0xff] }
  0xc6   : > { %5147 = vmatprep.mubr.msk.f32.mxu0 %vm322_vm0, %v6278_v57  ;;  %5596 = vmatpush3.bf16.msra.mxu0 %v5593_v39  ;;  %v5605_v57 = vpack.c.bf16 %v4241_v56, %v4240_v25  ;;  %v8176_v39 = vld [vmem:[#allocation31_spill] sm:$0xff]  ;;  %v8183_v25 = vld [vmem:[#allocation40_spill] sm:$0xff]  ;;  %v8184_v56 = vld [vmem:[#allocation41_spill] sm:$0xff] }
  0xc7   : > { %5598 = vmatprep.subr.bf16.mxu0 %v5597_v37 }
  0xc8   : > { %4916 = vmatmul.mubr.msk.f32.gmra.mrb[20].mxu1 %vm322_vm0, %v6990_v16 }
  0xc9   : > { %5148 = vmatmul.mubr.msk.f32.gmra.mrb[4].mxu0 %vm322_vm0, %v6301_v0  ;;  %4918 = vmatprep.mubr.msk.f32.mxu1 %vm322_vm0, %v6995_v63  ;;  %v8162_v0 = vld [vmem:[#allocation17_spill] sm:$0xff] }
  0xca   : > { %5150 = vmatprep.mubr.msk.f32.mxu0 %vm322_vm0, %v6304_v1  ;;  %5600 = vmatpush3.bf16.msra.mxu0 %v5597_v37  ;;  %v8163_v1 = vld [vmem:[#allocation20_spill] sm:$0xff] }
  0xcb   : > { %5602 = vmatprep.subr.bf16.mxu0 %v5601_v48  ;;  %v8179_v37 = vld [vmem:[#allocation36_spill] sm:$0xff] }
  0xcc   : > { %4919 = vmatmul.mubr.msk.f32.gmra.mrb[22].mxu1 %vm322_vm0, %v7009_v7 }
  0xcd   : > { %5151 = vmatmul.mubr.msk.f32.gmra.mrb[6].mxu0 %vm322_vm0, %v6318_v5  ;;  %4921 = vmatprep.mubr.msk.f32.mxu1 %vm322_vm0, %v7014_v14  ;;  %v7245_v5 = vld [vmem:[%s6165_s10 + $0x198] sm:$0xff] }
  0xce   : > { %5153 = vmatprep.mubr.msk.f32.mxu0 %vm322_vm0, %v6321_v8  ;;  %5604 = vmatpush3.bf16.msra.mxu0 %v5601_v48  ;;  %v7256_v8 = vld [vmem:[%s6165_s10 + $0x1a0] sm:$0xff]  ;;  %v8182_v48 = vld [vmem:[#allocation39_spill] sm:$0xff] }
  0xcf   : > { %5606 = vmatprep.subr.bf16.mxu0 %v5605_v57 }
  0xd0   : > { %4922 = vmatmul.mubr.msk.f32.gmra.mrb[24].mxu1 %vm322_vm0, %v7028_v29 }
  0xd1   : > { %5154 = vmatmul.mubr.msk.f32.gmra.mrb[8].mxu0 %vm322_vm0, %v6344_v13  ;;  %4924 = vmatprep.mubr.msk.f32.mxu1 %vm322_vm0, %v7033_v4  ;;  %v4243_v13 = vld [vmem:[%s8026_s1 + $0x218] sm:$0xff] }
  0xd2   : > { %5156 = vmatprep.mubr.msk.f32.mxu0 %vm322_vm0, %v8144_v50  ;;  %v8169_v50 = vld [vmem:[#allocation21_spill] sm:$0xff] }
  0xd4   : > { %4925 = vmatmul.mubr.msk.f32.gmra.mrb[26].mxu1 %vm322_vm0, %v7047_v49 }
  0xd5   : > { %5157 = vmatmul.mubr.msk.f32.gmra.mrb[10].mxu0 %vm322_vm0, %v8145_v17  ;;  %4927 = vmatprep.mubr.msk.f32.mxu1 %vm322_vm0, %v7052_v40  ;;  %v8170_v17 = vld [vmem:[#allocation22_spill] sm:$0xff] }
  0xd6   : > { %5159 = vmatprep.mubr.msk.f32.mxu0 %vm322_vm0, %v8147_v47  ;;  %v8171_v47 = vld [vmem:[#allocation24_spill] sm:$0xff] }
  0xd8   : > { %4928 = vmatmul.mubr.msk.f32.gmra.mrb[28].mxu1 %vm322_vm0, %v7065_v15 }
  0xd9   : > { %5160 = vmatmul.mubr.msk.f32.gmra.mrb[12].mxu0 %vm322_vm0, %v8148_v20  ;;  %4930 = vmatprep.mubr.msk.f32.mxu1 %vm322_vm0, %v7069_v23 }
  0xda   : > { %5162 = vmatprep.mubr.msk.f32.mxu0 %vm322_vm0, %v8150_v22 }
  0xdc   : > { %4931 = vmatmul.mubr.msk.f32.gmra.mrb[30].mxu1 %vm322_vm0, %v7082_v54 }
  0xdd   : > { %5163 = vmatmul.mubr.msk.f32.gmra.mrb[14].mxu0 %vm322_vm0, %v8151_v35  ;;  %4973 = vmatprep.mubr.msk.f32.mxu1 %vm322_vm0, %v8150_v22  ;;  %v4246_v22 = vld [vmem:[%s8026_s1 + $0x230] sm:$0xff] }
  0xde   : > { %5165 = vmatprep.mubr.msk.f32.mxu0 %vm322_vm0, %v8153_v36 }
  0xe0   : > { %4974 = vmatmul.mubr.msk.f32.vlgmr.msra.gmra.mrb[16].mxu1 %vm322_vm0, %v8151_v35  ;;  %v4247_v35 = vld [vmem:[%s8026_s1 + $0x238] sm:$0xff] }
  0xe1   : > { %5166 = vmatmul.mubr.msk.f32.gmra.mrb[16].mxu0 %vm322_vm0, %v8162_v0  ;;  %4976 = vmatprep.mubr.msk.f32.mxu1 %vm322_vm0, %v8153_v36  ;;  %v8167_v36 = vld [vmem:[#allocation18_spill] sm:$0xff] }
  0xe2   : > { %5168 = vmatprep.mubr.msk.f32.mxu0 %vm322_vm0, %v6479_v3 }
  0xe4   : > { %4977 = vmatmul.mubr.msk.f32.gmra.mrb[18].mxu1 %vm322_vm0, %v8162_v0  ;;  %v8186_v0 = vld [vmem:[#allocation43_spill] sm:$0xff] }
  0xe5   : > { %5169 = vmatmul.mubr.msk.f32.gmra.mrb[18].mxu0 %vm322_vm0, %v8163_v1  ;;  %4979 = vmatprep.mubr.msk.f32.mxu1 %vm322_vm0, %v6479_v3  ;;  %v8164_v3 = vld [vmem:[#allocation12_spill] sm:$0xff] }
  0xe6   : > { %5171 = vmatprep.mubr.msk.f32.mxu0 %vm322_vm0, %v6511_v32 }
  0xe8   : > { %4980 = vmatmul.mubr.msk.f32.gmra.mrb[20].mxu1 %vm322_vm0, %v8163_v1  ;;  %v8187_v1 = vld [vmem:[#allocation44_spill] sm:$0xff] }
  0xe9   : > { %5172 = vmatmul.mubr.msk.f32.gmra.mrb[20].mxu0 %vm322_vm0, %v8157_v33  ;;  %4982 = vmatprep.mubr.msk.f32.mxu1 %vm322_vm0, %v6511_v32 }
  0xea   : > { %5174 = vmatprep.mubr.msk.f32.mxu0 %vm322_vm0, %v6539_v55 }
  0xec   : > { %4983 = vmatmul.mubr.msk.f32.gmra.mrb[22].mxu1 %vm322_vm0, %v8157_v33  ;;  %v8172_v33 = vld [vmem:[#allocation25_spill] sm:$0xff] }
  0xed   : > { %5175 = vmatmul.mubr.msk.f32.gmra.mrb[22].mxu0 %vm322_vm0, %v6558_v10  ;;  %4985 = vmatprep.mubr.msk.f32.mxu1 %vm322_vm0, %v6539_v55  ;;  %v4244_v55 = vld [vmem:[%s8026_s1 + $0x220] sm:$0xff] }
  0xee   : > { %5177 = vmatprep.mubr.msk.f32.mxu0 %vm322_vm0, %v6566_v19 }
  0xf0   : > { %4986 = vmatmul.mubr.msk.f32.gmra.mrb[24].mxu1 %vm322_vm0, %v6558_v10  ;;  %v4245_v10 = vld [vmem:[%s8026_s1 + $0x228] sm:$0xff] }
  0xf1   : > { %5178 = vmatmul.mubr.msk.f32.gmra.mrb[24].mxu0 %vm322_vm0, %v6584_v43  ;;  %4988 = vmatprep.mubr.msk.f32.mxu1 %vm322_vm0, %v6566_v19  ;;  %v8165_v19 = vld [vmem:[#allocation14_spill] sm:$0xff]  ;;  %v5613_v20 = vpack.c.bf16 %v4245_v10, %v4244_v55  ;;  %v2611_v55 = vrot.slane %v7256_v8, 1  ;;  %v7337_v10 = vld [vmem:[%s6165_s10 + $0x1a8] sm:$0x3] }
  0xf2   : > { %5180 = vmatprep.mubr.msk.f32.mxu0 %vm322_vm0, %v6594_v12 }
  0xf4   : > { %4989 = vmatmul.mubr.msk.f32.gmra.mrb[26].mxu1 %vm322_vm0, %v6584_v43  ;;  %v8166_v43 = vld [vmem:[#allocation16_spill] sm:$0xff] }
  0xf5   : > { %5181 = vmatmul.mubr.msk.f32.gmra.mrb[26].mxu0 %vm322_vm0, %v8161_v62  ;;  %4991 = vmatprep.mubr.msk.f32.mxu1 %vm322_vm0, %v6594_v12  ;;  %v4242_v12 = vld [vmem:[%s8026_s1 + $0x210] sm:$0xff] }
  0xf6   : > { %5183 = vmatprep.mubr.msk.f32.mxu0 %vm322_vm0, %v6752_v61  ;;  %v5609_v32 = vpack.c.bf16 %v4243_v13, %v4242_v12  ;;  %v8188_v12 = vld [vmem:[#allocation45_spill] sm:$0xff]  ;;  %v8189_v13 = vld [vmem:[#allocation46_spill] sm:$0xff] }
  0xf8   : > { %4992 = vmatmul.mubr.msk.f32.gmra.mrb[28].mxu1 %vm322_vm0, %v8161_v62  ;;  %v8173_v62 = vld [vmem:[#allocation27_spill] sm:$0xff] }
  0xf9   : > { %5184 = vmatmul.mubr.msk.f32.gmra.mrb[28].mxu0 %vm322_vm0, %v6755_v34  ;;  %4994 = vmatprep.mubr.msk.f32.mxu1 %vm322_vm0, %v6752_v61  ;;  %v8168_v61 = vld [vmem:[#allocation19_spill] sm:$0xff] }
  0xfa   : > { %5186 = vmatprep.mubr.msk.f32.mxu0 %vm322_vm0, %v7245_v5 }
  0xfc   : > { %4995 = vmatmul.mubr.msk.f32.gmra.mrb[30].mxu1 %vm322_vm0, %v6755_v34  ;;  %v5617_v34 = vpack.c.bf16 %v4247_v35, %v4246_v22  ;;  %v8193_v35 = vld [vmem:[#allocation50_spill] sm:$0xff] }
  0xfd   : > { %5187 = vmatmul.mubr.msk.f32.gmra.mrb[30].mxu0 %vm322_vm0, %v7256_v8 }
  0xfe   : > { %5205 = vmatprep.mubr.msk.f32.mxu0 %vm322_vm0, %v8164_v3  ;;  %v8190_v3 = vld [vmem:[#allocation47_spill] sm:$0xff] }
 0x101   : > { %5206 = vmatmul.mubr.msk.f32.vlgmr.msra.gmra.mrb[0].mxu0 %vm322_vm0, %v8165_v19  ;;  %v8191_v19 = vld [vmem:[#allocation48_spill] sm:$0xff] }
 0x102   : > { %5608 = vmatpush3.bf16.msra.mxu0 %v5605_v57  ;;  %5208 = vmatprep.mubr.msk.f32.mxu0 %vm322_vm0, %v8166_v43  ;;  %v8185_v57 = vld [vmem:[#allocation42_spill] sm:$0xff]  ;;  %v8192_v43 = vld [vmem:[#allocation49_spill] sm:$0xff] }
 0x103   : > { %5610 = vmatprep.subr.bf16.mxu0 %v5609_v32 }
 0x105   : > { %5209 = vmatmul.mubr.msk.f32.gmra.mrb[2].mxu0 %vm322_vm0, %v8167_v36 }
 0x106   : > { %5211 = vmatprep.mubr.msk.f32.mxu0 %vm322_vm0, %v8168_v61  ;;  %5612 = vmatpush3.bf16.msra.mxu0 %v5609_v32  ;;  %v2610_v32 = vrot.slane %v7245_v5, 1  ;;  %v8194_v61 = vld [vmem:[#allocation51_spill] sm:$0xff] }
 0x107   : > { %5614 = vmatprep.subr.bf16.mxu0 %v5613_v20 }
 0x108   : > { %v2612_v22 = vsel %vm692_vm2, %v2610_v32, %v2611_v55 }
 0x109   : > { %5212 = vmatmul.mubr.msk.f32.gmra.mrb[4].mxu0 %vm322_vm0, %v8169_v50  ;;  %v3169_v50 = vld [vmem:[%s8028_s3 + $0x48] sm:$0xff] }
 0x10a   : > { %5214 = vmatprep.mubr.msk.f32.mxu0 %vm322_vm0, %v8170_v17  ;;  %5616 = vmatpush3.bf16.msra.mxu0 %v5613_v20  ;;  %v2613_v20 = vrot.slane %v7337_v10, 1  ;;  %v3171_v17 = vld [vmem:[%s8028_s3 + $0x58] sm:$0xff] }
 0x10b   : > { %5618 = vmatprep.subr.bf16.mxu0 %v5617_v34 }
 0x10c   : > { %v2614_v36 = vsel %vm692_vm2, %v2611_v55, %v2613_v20 }
 0x10d   : > { %5215 = vmatmul.mubr.msk.f32.gmra.mrb[6].mxu0 %vm322_vm0, %v8171_v47  ;;  %v3173_v47 = vld [vmem:[%s8028_s3 + $0x68] sm:$0xff] }
 0x10e   : > { %5217 = vmatprep.mubr.msk.f32.mxu0 %vm322_vm0, %v8172_v33  ;;  %5620 = vmatpush3.bf16.msra.mxu0 %v5617_v34  ;;  %v3167_v34 = vld [vmem:[%s8028_s3 + $0x38] sm:$0xff] }
 0x111   : > { %5218 = vmatmul.mubr.msk.f32.gmra.mrb[8].mxu0 %vm322_vm0, %v8173_v62 }
 0x112   : > { %5220 = vmatprep.mubr.msk.f32.mxu0 %vm322_vm0, %v8174_v28 }
 0x115   : > { %5221 = vmatmul.mubr.msk.f32.gmra.mrb[10].mxu0 %vm322_vm0, %v8175_v9 }
 0x116   : > { %5223 = vmatprep.mubr.msk.f32.mxu0 %vm322_vm0, %v8176_v39 }
 0x119   : > { %5224 = vmatmul.mubr.msk.f32.gmra.mrb[12].mxu0 %vm322_vm0, %v8177_v58 }
 0x11a   : > { %5226 = vmatprep.mubr.msk.f32.mxu0 %vm322_vm0, %v8178_v30 }
 0x11d   : > { %5227 = vmatmul.mubr.msk.f32.gmra.mrb[14].mxu0 %vm322_vm0, %v8179_v37  ;;  %v3174_v37 = vld [vmem:[%s8028_s3 + $0x70] sm:$0xff] }
 0x11e   : > { %5229 = vmatprep.mubr.msk.f32.mxu0 %vm322_vm0, %v8180_v38  ;;  %v3175_v38 = vld [vmem:[%s8028_s3 + $0x78] sm:$0xff] }
 0x121   : > { %5230 = vmatmul.mubr.msk.f32.gmra.mrb[16].mxu0 %vm322_vm0, %v8181_v46  ;;  %v7509_v46 = vpack.c.bf16 %v3175_v38, %v3174_v37 }
 0x122   : > { %5232 = vmatprep.mubr.msk.f32.mxu0 %vm322_vm0, %v8182_v48 }
 0x125   : > { %5233 = vmatmul.mubr.msk.f32.gmra.mrb[18].mxu0 %vm322_vm0, %v8183_v25 }
 0x126   : > { %5235 = vmatprep.mubr.msk.f32.mxu0 %vm322_vm0, %v8184_v56 }
 0x129   : > { %5236 = vmatmul.mubr.msk.f32.gmra.mrb[20].mxu0 %vm322_vm0, %v8185_v57 }
 0x12a   : > { %5238 = vmatprep.mubr.msk.f32.mxu0 %vm322_vm0, %v8186_v0 }
 0x12d   : > { %5239 = vmatmul.mubr.msk.f32.gmra.mrb[22].mxu0 %vm322_vm0, %v8187_v1 }
 0x12e   : > { %5241 = vmatprep.mubr.msk.f32.mxu0 %vm322_vm0, %v8188_v12 }
 0x131   : > { %5242 = vmatmul.mubr.msk.f32.gmra.mrb[24].mxu0 %vm322_vm0, %v8189_v13 }
 0x132   : > { %5244 = vmatprep.mubr.msk.f32.mxu0 %vm322_vm0, %v8190_v3 }
 0x135   : > { %5245 = vmatmul.mubr.msk.f32.gmra.mrb[26].mxu0 %vm322_vm0, %v8191_v19 }
 0x136   : > { %5247 = vmatprep.mubr.msk.f32.mxu0 %vm322_vm0, %v8192_v43 }
 0x139   : > { %5248 = vmatmul.mubr.msk.f32.gmra.mrb[28].mxu0 %vm322_vm0, %v8193_v35  ;;  %v7549_v35 = vld [vmem:[%s8027_s2] ss:$0 sm:$0xff] }
 0x13a   : > { %5250 = vmatprep.mubr.msk.f32.mxu0 %vm322_vm0, %v2612_v22 }
 0x13d   : > { %5251 = vmatmul.mubr.msk.f32.gmra.mrb[30].mxu0 %vm322_vm0, %v2614_v36 }
 0x13e   : > { %5269 = vmatprep.mubr.msk.f32.mxu0 %vm322_vm0, %v6819_v27  ;;  %v3160_v27 = vld [vmem:[%s8028_s3] sm:$0xff] }
 0x141   : > { %5270 = vmatmul.mubr.msk.f32.vlgmr.msra.gmra.mrb[0].mxu0 %vm322_vm0, %v6839_v31  ;;  %v3161_v31 = vld [vmem:[%s8028_s3 + $0x8] sm:$0xff] }
 0x142   : > { %5272 = vmatprep.mubr.msk.f32.mxu0 %vm322_vm0, %v6843_v26  ;;  %v3162_v26 = vld [vmem:[%s8028_s3 + $0x10] sm:$0xff] }
 0x145   : > { %5273 = vmatmul.mubr.msk.f32.gmra.mrb[2].mxu0 %vm322_vm0, %v8194_v61 }
 0x146   : > { %5275 = vmatprep.mubr.msk.f32.mxu0 %vm322_vm0, %v6866_v2  ;;  %v7381_v2 = vpack.c.bf16 %v3161_v31, %v3160_v27 }
 0x148   : > { %5622 = vmatprep.subr.bf16.mxu1 %v7381_v2 }
 0x149   : > { %5276 = vmatmul.mubr.msk.f32.gmra.mrb[4].mxu0 %vm322_vm0, %v6885_v60  ;;  %v3163_v60 = vld [vmem:[%s8028_s3 + $0x18] sm:$0xff]  ;;  %5624 = vmatpush3.bf16.msra.mxu1 %v7381_v2 }
 0x14a   : > { %5278 = vmatprep.mubr.msk.f32.mxu0 %vm322_vm0, %v6889_v21  ;;  %v7386_v21 = vpack.c.bf16 %v3163_v60, %v3162_v26 }
 0x14c   : > { %5626 = vmatprep.subr.bf16.mxu1 %v7386_v21 }
 0x14d   : > { %5279 = vmatmul.mubr.msk.f32.gmra.mrb[6].mxu0 %vm322_vm0, %v6904_v18  ;;  %v3164_v18 = vld [vmem:[%s8028_s3 + $0x20] sm:$0xff]  ;;  %5628 = vmatpush3.bf16.msra.mxu1 %v7386_v21 }
 0x14e   : > { %5281 = vmatprep.mubr.msk.f32.mxu0 %vm322_vm0, %v6908_v24  ;;  %v3165_v24 = vld [vmem:[%s8028_s3 + $0x28] sm:$0xff] }
 0x151   : > { %5282 = vmatmul.mubr.msk.f32.gmra.mrb[8].mxu0 %vm322_vm0, %v6922_v45  ;;  %v7401_v45 = vpack.c.bf16 %v3165_v24, %v3164_v18 }
 0x152   : > { %5284 = vmatprep.mubr.msk.f32.mxu0 %vm322_vm0, %v6926_v11  ;;  %v3166_v11 = vld [vmem:[%s8028_s3 + $0x30] sm:$0xff] }
 0x153   : > { %5630 = vmatprep.subr.bf16.mxu1 %v7401_v45 }
 0x154   : > { %5632 = vmatpush3.bf16.msra.mxu1 %v7401_v45 }
 0x155   : > { %5285 = vmatmul.mubr.msk.f32.gmra.mrb[10].mxu0 %vm322_vm0, %v6939_v44  ;;  %v7415_v44 = vpack.c.bf16 %v3167_v34, %v3166_v11 }
 0x156   : > { %5287 = vmatprep.mubr.msk.f32.mxu0 %vm322_vm0, %v6943_v42  ;;  %v3168_v42 = vld [vmem:[%s8028_s3 + $0x40] sm:$0xff] }
 0x157   : > { %5634 = vmatprep.subr.bf16.mxu1 %v7415_v44 }
 0x158   : > { %5636 = vmatpush3.bf16.msra.mxu1 %v7415_v44 }
 0x159   : > { %5288 = vmatmul.mubr.msk.f32.gmra.mrb[12].mxu0 %vm322_vm0, %v6956_v59  ;;  %v7429_v59 = vpack.c.bf16 %v3169_v50, %v3168_v42 }
 0x15a   : > { %5290 = vmatprep.mubr.msk.f32.mxu0 %vm322_vm0, %v6960_v53  ;;  %v3170_v53 = vld [vmem:[%s8028_s3 + $0x50] sm:$0xff] }
 0x15b   : > { %5638 = vmatprep.subr.bf16.mxu1 %v7429_v59 }
 0x15c   : > { %5640 = vmatpush3.bf16.msra.mxu1 %v7429_v59 }
 0x15d   : > { %5291 = vmatmul.mubr.msk.f32.gmra.mrb[14].mxu0 %vm322_vm0, %v6973_v52  ;;  %v7443_v52 = vpack.c.bf16 %v3171_v17, %v3170_v53 }
 0x15e   : > { %5293 = vmatprep.mubr.msk.f32.mxu0 %vm322_vm0, %v6977_v6  ;;  %v3172_v6 = vld [vmem:[%s8028_s3 + $0x60] sm:$0xff] }
 0x15f   : > { %5642 = vmatprep.subr.bf16.mxu1 %v7443_v52 }
 0x160   : > { %5644 = vmatpush3.bf16.msra.mxu1 %v7443_v52 }
 0x161   : > { %5294 = vmatmul.mubr.msk.f32.gmra.mrb[16].mxu0 %vm322_vm0, %v6990_v16  ;;  %v7457_v16 = vpack.c.bf16 %v3173_v47, %v3172_v6 }
 0x162   : > { %5296 = vmatprep.mubr.msk.f32.mxu0 %vm322_vm0, %v6995_v63  ;;  %v2885_v63 = vrot.slane %v7245_v5, 2 }
 0x163   : > { %5646 = vmatprep.subr.bf16.mxu1 %v7457_v16 }
 0x164   : > { %5648 = vmatpush3.bf16.msra.mxu1 %v7457_v16 }
 0x165   : > { %5297 = vmatmul.mubr.msk.f32.gmra.mrb[18].mxu0 %vm322_vm0, %v7009_v7  ;;  %v2886_v7 = vrot.slane %v7256_v8, 2  ;;  %5650 = vmatprep.subr.bf16.mxu1 %v7509_v46 }
 0x166   : > { %5299 = vmatprep.mubr.msk.f32.mxu0 %vm322_vm0, %v7014_v14 }
 0x168   : > { %5652 = vmatpush3.bf16.msra.mxu1 %v7509_v46 }
 0x169   : > { %5300 = vmatmul.mubr.msk.f32.gmra.mrb[20].mxu0 %vm322_vm0, %v7028_v29  ;;  %5654 = vmatprep.subr.bf16.mxu1 %v7381_v2 }
 0x16a   : > { %5302 = vmatprep.mubr.msk.f32.mxu0 %vm322_vm0, %v7033_v4  ;;  %v2888_v4 = vrot.slane %v7337_v10, 2 }
 0x16d   : > { %5303 = vmatmul.mubr.msk.f32.gmra.mrb[22].mxu0 %vm322_vm0, %v7047_v49 }
 0x16e   : > { %5305 = vmatprep.mubr.msk.f32.mxu0 %vm322_vm0, %v7052_v40  ;;  %v2887_v40 = vsel %vm1103_vm1, %v2885_v63, %v2886_v7 }
 0x171   : > { %5306 = vmatmul.mubr.msk.f32.gmra.mrb[24].mxu0 %vm322_vm0, %v7065_v15 }
 0x172   : > { %5308 = vmatprep.mubr.msk.f32.mxu0 %vm322_vm0, %v7069_v23  ;;  %v2889_v23 = vsel %vm1103_vm1, %v2886_v7, %v2888_v4 }
 0x173   : > { %v4887_v14 = vpop.f32.mrb[0].mxu1 }
 0x174   : > { %v1323_v29 = vpop.f32.mrb[1].mxu1  ;;  %v5693_v36 = vadd.f32 %v4887_v14, %v7549_v35 }
 0x175   : > { %5309 = vmatmul.mubr.msk.f32.gmra.mrb[26].mxu0 %vm322_vm0, %v7082_v54  ;;  %v5695_v61 = vadd.f32 %v7549_v35, %v1323_v29 }
 0x176   : > { %5311 = vmatprep.mubr.msk.f32.mxu0 %vm322_vm0, %v7086_v51 }
 0x177   : > { %v4890_v49 = vpop.f32.mrb[2].mxu1 }
 0x178   : > { %v1333_v15 = vpop.f32.mrb[3].mxu1  ;;  %v5697_v18 = vadd.f32 %v4890_v49, %v7549_v35 }
 0x179   : > { %5312 = vmatmul.mubr.msk.f32.gmra.mrb[28].mxu0 %vm322_vm0, %v7097_v41  ;;  %v5699_v24 = vadd.f32 %v7549_v35, %v1333_v15 }
 0x17a   : > { %5314 = vmatprep.mubr.msk.f32.mxu0 %vm322_vm0, %v2887_v40 }
 0x17b   : > { %v4893_v5 = vpop.f32.mrb[4].mxu1 }
 0x17c   : > { %v1343_v8 = vpop.f32.mrb[5].mxu1  ;;  %v5701_v53 = vadd.f32 %v4893_v5, %v7549_v35 }
 0x17d   : > { %5315 = vmatmul.mubr.msk.f32.gmra.mrb[30].mxu0 %vm322_vm0, %v2889_v23  ;;  %v5703_v17 = vadd.f32 %v7549_v35, %v1343_v8 }
 0x17f   : > { %v4896_v54 = vpop.f32.mrb[6].mxu1 }
 0x180   : > { %v1353_v33 = vpop.f32.mrb[7].mxu1 }
 0x181   : > { %v5707_v14 = vadd.f32 %v7549_v35, %v1353_v33 }
 0x183   : > { %v7487_v51 = vpop.f32.mrb[8].mxu1 }
 0x184   : > { %v7489_v62 = vpop.f32.mrb[9].mxu1 }
 0x185   : > { %v5711_v15 = vadd.f32 %v7549_v35, %v7489_v62 }
 0x187   : > { %v7491_v28 = vpop.f32.mrb[10].mxu1 }
 0x188   : > { %v7493_v9 = vpop.f32.mrb[11].mxu1 }
 0x189   : > { %v5715_v33 = vadd.f32 %v7549_v35, %v7493_v9 }
 0x18b   : > { %v7495_v39 = vpop.f32.mrb[12].mxu1 }
 0x18c   : > { %v7497_v41 = vpop.f32.mrb[13].mxu1 }
 0x18f   : > { %v7499_v58 = vpop.f32.mrb[14].mxu1 }
 0x190   : > { %v7501_v30 = vpop.f32.mrb[15].mxu1 }
 0x1b3   : > { %v7514_v48 = vpop.f32.mrb[16].mxu1 }
 0x1b4   : > { %v7516_v25 = vpop.f32.mrb[17].mxu1 }
 0x1b7   : > { %v7518_v56 = vpop.f32.mrb[18].mxu1 }
 0x1b8   : > { %v7520_v57 = vpop.f32.mrb[19].mxu1 }
 0x1bb   : > { %v7522_v0 = vpop.f32.mrb[20].mxu1 }
 0x1bc   : > { %v7524_v1 = vpop.f32.mrb[21].mxu1 }
 0x1bf   : > { %v7526_v12 = vpop.f32.mrb[22].mxu1 }
 0x1c0   : > { %v7528_v13 = vpop.f32.mrb[23].mxu1 }
 0x1c3   : > { %v7530_v3 = vpop.f32.mrb[24].mxu1 }
 0x1c4   : > { %v7532_v32 = vpop.f32.mrb[25].mxu1 }
 0x1c7   : > { %v7534_v55 = vpop.f32.mrb[26].mxu1 }
 0x1c8   : > { %v7536_v10 = vpop.f32.mrb[27].mxu1 }
 0x1cb   : > { %v7538_v19 = vpop.f32.mrb[28].mxu1 }
 0x1cc   : > { %v7540_v43 = vpop.f32.mrb[29].mxu1 }
 0x1cf   : > { %v7542_v20 = vpop.f32.mrb[30].mxu1 }
 0x1d0   : > { %v7544_v22 = vpop.f32.mrb[31].mxu1 }
 0x214   : > { %v5271_v27 = vpop.f32.mrb[0].mxu0 }
 0x215   : > { %v7553_v31 = vadd.f32 %v5693_v36, %v5271_v27  ;;  %v2969_v26 = vpop.f32.mrb[1].mxu0 }
 0x216   : > { %v7555_v60 = vadd.f32 %v5695_v61, %v2969_v26 }
 0x218   : > { %v5274_v11 = vpop.f32.mrb[2].mxu0  ;;  %5349 = vmatprep.mubr.f32.mxu1 %v7555_v60 }
 0x219   : > { %v7560_v34 = vadd.f32 %v5697_v18, %v5274_v11  ;;  %v2979_v42 = vpop.f32.mrb[3].mxu0  ;;  %5350 = vmatmul.mubr.f32.vlgmr.msra.gmra.mrb[32].mxu1 %v7553_v31 }
 0x21a   : > { %v7563_v50 = vadd.f32 %v5699_v24, %v2979_v42  ;;  %5656 = vmatpush3.bf16.msra.mxu1 %v7381_v2  ;;  %v5705_v2 = vadd.f32 %v4896_v54, %v7549_v35 }
 0x21b   : > { %5658 = vmatprep.subr.bf16.mxu1 %v7386_v21 }
 0x21c   : > { %v5277_v6 = vpop.f32.mrb[4].mxu0  ;;  %5352 = vmatprep.mubr.f32.mxu1 %v7563_v50 }
 0x21d   : > { %v7570_v47 = vadd.f32 %v5701_v53, %v5277_v6  ;;  %v2989_v63 = vpop.f32.mrb[5].mxu0  ;;  %5353 = vmatmul.mubr.f32.gmra.mrb[34].mxu1 %v7560_v34 }
 0x21e   : > { %v7573_v7 = vadd.f32 %v5703_v17, %v2989_v63  ;;  %5660 = vmatpush3.bf16.msra.mxu1 %v7386_v21  ;;  %v5709_v21 = vadd.f32 %v7487_v51, %v7549_v35 }
 0x21f   : > { %5662 = vmatprep.subr.bf16.mxu1 %v7401_v45 }
 0x220   : > { %v5280_v29 = vpop.f32.mrb[6].mxu0  ;;  %5355 = vmatprep.mubr.f32.mxu1 %v7573_v7 }
 0x221   : > { %v7580_v4 = vadd.f32 %v5705_v2, %v5280_v29  ;;  %v2999_v49 = vpop.f32.mrb[7].mxu0  ;;  %5356 = vmatmul.mubr.f32.gmra.mrb[36].mxu1 %v7570_v47  ;;  %v5733_v2 = vadd.f32 %v7522_v0, %v7549_v35 }
 0x222   : > { %v7583_v40 = vadd.f32 %v5707_v14, %v2999_v49  ;;  %5664 = vmatpush3.bf16.msra.mxu1 %v7401_v45  ;;  %v5713_v45 = vadd.f32 %v7491_v28, %v7549_v35  ;;  %v5719_v28 = vadd.f32 %v7549_v35, %v7497_v41  ;;  %v5737_v49 = vadd.f32 %v7526_v12, %v7549_v35 }
 0x223   : > { %5666 = vmatprep.subr.bf16.mxu1 %v7415_v44 }
 0x224   : > { %v5283_v23 = vpop.f32.mrb[8].mxu0  ;;  %5358 = vmatprep.mubr.f32.mxu1 %v7583_v40 }
 0x225   : > { %v7592_v5 = vadd.f32 %v5709_v21, %v5283_v23  ;;  %v3009_v8 = vpop.f32.mrb[9].mxu0  ;;  %5359 = vmatmul.mubr.f32.gmra.mrb[38].mxu1 %v7580_v4  ;;  %v5739_v21 = vadd.f32 %v7549_v35, %v7528_v13 }
 0x226   : > { %v7595_v54 = vadd.f32 %v5711_v15, %v3009_v8  ;;  %5668 = vmatpush3.bf16.msra.mxu1 %v7415_v44  ;;  %v5717_v44 = vadd.f32 %v7495_v39, %v7549_v35  ;;  %v5723_v39 = vadd.f32 %v7549_v35, %v7501_v30  ;;  %v5741_v8 = vadd.f32 %v7530_v3, %v7549_v35 }
 0x227   : > { %5670 = vmatprep.subr.bf16.mxu1 %v7429_v59 }
 0x228   : > { %v5286_v51 = vpop.f32.mrb[10].mxu0  ;;  %5361 = vmatprep.mubr.f32.mxu1 %v7595_v54 }
 0x229   : > { %v7604_v62 = vadd.f32 %v5713_v45, %v5286_v51  ;;  %v3019_v37 = vpop.f32.mrb[11].mxu0  ;;  %5362 = vmatmul.mubr.f32.gmra.mrb[40].mxu1 %v7592_v5  ;;  %v5743_v45 = vadd.f32 %v7549_v35, %v7532_v32 }
 0x22a   : > { %v7607_v38 = vadd.f32 %v5715_v33, %v3019_v37  ;;  %5672 = vmatpush3.bf16.msra.mxu1 %v7429_v59  ;;  %v5721_v59 = vadd.f32 %v7499_v58, %v7549_v35  ;;  %v5727_v58 = vadd.f32 %v7549_v35, %v7516_v25  ;;  %v5745_v37 = vadd.f32 %v7534_v55, %v7549_v35 }
 0x22b   : > { %5674 = vmatprep.subr.bf16.mxu1 %v7443_v52 }
 0x22c   : > { %v5289_v9 = vpop.f32.mrb[12].mxu0  ;;  %5364 = vmatprep.mubr.f32.mxu1 %v7607_v38 }
 0x22d   : > { %v7616_v36 = vadd.f32 %v5717_v44, %v5289_v9  ;;  %v3029_v61 = vpop.f32.mrb[13].mxu0  ;;  %5365 = vmatmul.mubr.f32.gmra.mrb[42].mxu1 %v7604_v62  ;;  %v5747_v44 = vadd.f32 %v7549_v35, %v7536_v10 }
 0x22e   : > { %v7619_v27 = vadd.f32 %v5719_v28, %v3029_v61  ;;  %5676 = vmatpush3.bf16.msra.mxu1 %v7443_v52  ;;  %v5725_v52 = vadd.f32 %v7514_v48, %v7549_v35  ;;  %v5731_v48 = vadd.f32 %v7549_v35, %v7520_v57  ;;  %v5749_v61 = vadd.f32 %v7538_v19, %v7549_v35 }
 0x22f   : > { %5678 = vmatprep.subr.bf16.mxu1 %v7457_v16 }
 0x230   : > { %v5292_v41 = vpop.f32.mrb[14].mxu0  ;;  %5367 = vmatprep.mubr.f32.mxu1 %v7619_v27 }
 0x231   : > { %v7628_v26 = vadd.f32 %v5721_v59, %v5292_v41  ;;  %v3039_v18 = vpop.f32.mrb[15].mxu0  ;;  %5368 = vmatmul.mubr.f32.gmra.mrb[44].mxu1 %v7616_v36  ;;  %v5751_v59 = vadd.f32 %v7549_v35, %v7540_v43 }
 0x232   : > { %v7631_v24 = vadd.f32 %v5723_v39, %v3039_v18  ;;  %5680 = vmatpush3.bf16.msra.mxu1 %v7457_v16  ;;  %v5729_v16 = vadd.f32 %v7518_v56, %v7549_v35  ;;  %v5753_v18 = vadd.f32 %v7542_v20, %v7549_v35 }
 0x233   : > { %5682 = vmatprep.subr.bf16.mxu1 %v7509_v46 }
 0x234   : > { %v5295_v30 = vpop.f32.mrb[16].mxu0  ;;  %5370 = vmatprep.mubr.f32.mxu1 %v7631_v24 }
 0x235   : > { %v7640_v11 = vadd.f32 %v5725_v52, %v5295_v30  ;;  %v3049_v42 = vpop.f32.mrb[17].mxu0  ;;  %5371 = vmatmul.mubr.f32.gmra.mrb[46].mxu1 %v7628_v26  ;;  %v5755_v52 = vadd.f32 %v7549_v35, %v7544_v22 }
 0x236   : > { %v7643_v53 = vadd.f32 %v5727_v58, %v3049_v42  ;;  %5684 = vmatpush3.bf16.msra.mxu1 %v7509_v46  ;;  %v5735_v46 = vadd.f32 %v7549_v35, %v7524_v1 }
 0x238   : > { %v5298_v17 = vpop.f32.mrb[18].mxu0  ;;  %5373 = vmatprep.mubr.f32.mxu1 %v7643_v53 }
 0x239   : > { %v7651_v25 = vadd.f32 %v5729_v16, %v5298_v17  ;;  %v3059_v6 = vpop.f32.mrb[19].mxu0  ;;  %5374 = vmatmul.mubr.f32.gmra.mrb[48].mxu1 %v7640_v11 }
 0x23a   : > { %v7654_v63 = vadd.f32 %v5731_v48, %v3059_v6 }
 0x23c   : > { %v5301_v56 = vpop.f32.mrb[20].mxu0  ;;  %5376 = vmatprep.mubr.f32.mxu1 %v7654_v63 }
 0x23d   : > { %v7661_v57 = vadd.f32 %v5733_v2, %v5301_v56  ;;  %v3069_v14 = vpop.f32.mrb[21].mxu0  ;;  %5377 = vmatmul.mubr.f32.gmra.mrb[50].mxu1 %v7651_v25 }
 0x23e   : > { %v7664_v29 = vadd.f32 %v5735_v46, %v3069_v14 }
 0x240   : > { %v5304_v0 = vpop.f32.mrb[22].mxu0  ;;  %5379 = vmatprep.mubr.f32.mxu1 %v7664_v29 }
 0x241   : > { %v7671_v1 = vadd.f32 %v5737_v49, %v5304_v0  ;;  %v3079_v15 = vpop.f32.mrb[23].mxu0  ;;  %5380 = vmatmul.mubr.f32.gmra.mrb[52].mxu1 %v7661_v57 }
 0x242   : > { %v7674_v23 = vadd.f32 %v5739_v21, %v3079_v15 }
 0x244   : > { %v5307_v12 = vpop.f32.mrb[24].mxu0  ;;  %5382 = vmatprep.mubr.f32.mxu1 %v7674_v23 }
 0x245   : > { %v7681_v13 = vadd.f32 %v5741_v8, %v5307_v12  ;;  %v3089_v33 = vpop.f32.mrb[25].mxu0  ;;  %5383 = vmatmul.mubr.f32.gmra.mrb[54].mxu1 %v7671_v1 }
 0x246   : > { %v7684_v51 = vadd.f32 %v5743_v45, %v3089_v33 }
 0x248   : > { %v5310_v3 = vpop.f32.mrb[26].mxu0  ;;  %5385 = vmatprep.mubr.f32.mxu1 %v7684_v51 }
 0x249   : > { %v7691_v32 = vadd.f32 %v5745_v37, %v5310_v3  ;;  %v3099_v28 = vpop.f32.mrb[27].mxu0  ;;  %5386 = vmatmul.mubr.f32.gmra.mrb[56].mxu1 %v7681_v13 }
 0x24a   : > { %v7694_v9 = vadd.f32 %v5747_v44, %v3099_v28 }
 0x24c   : > { %v5313_v55 = vpop.f32.mrb[28].mxu0  ;;  %5388 = vmatprep.mubr.f32.mxu1 %v7694_v9 }
 0x24d   : > { %v7701_v10 = vadd.f32 %v5749_v61, %v5313_v55  ;;  %v3109_v39 = vpop.f32.mrb[29].mxu0  ;;  %5389 = vmatmul.mubr.f32.gmra.mrb[58].mxu1 %v7691_v32 }
 0x24e   : > { %v7704_v41 = vadd.f32 %v5751_v59, %v3109_v39 }
 0x250   : > { %v5316_v19 = vpop.f32.mrb[30].mxu0  ;;  %5391 = vmatprep.mubr.f32.mxu1 %v7704_v41 }
 0x251   : > { %v7711_v43 = vadd.f32 %v5753_v18, %v5316_v19  ;;  %v3119_v58 = vpop.f32.mrb[31].mxu0  ;;  %5392 = vmatmul.mubr.f32.gmra.mrb[60].mxu1 %v7701_v10 }
 0x252   : > { %v7714_v30 = vadd.f32 %v5755_v52, %v3119_v58 }
 0x254   : > { %5394 = vmatprep.mubr.f32.mxu1 %v7714_v30 }
 0x255   : > { %5395 = vmatmul.mubr.f32.gmra.mrb[62].mxu1 %v7711_v43 }
 0x2ec   : > { %v5351_v42 = vpop.f32.mrb[32].mxu1 }
 0x2ed   : > { %v7719_v20 = vsub.f32 %v7553_v31, %v5351_v42  ;;  %v3242_v16 = vpop.f32.mrb[33].mxu1 }
 0x2ee   : > { %v7722_v22 = vsub.f32 %v7555_v60, %v3242_v16 }
 0x2ef   : > { %v3434_v17 = vmul.f32 %v7719_v20, %v7719_v20 }
 0x2f0   : > { %v3433_v35 = vmul.f32 %v7722_v22, %v7722_v22  ;;  %v5354_v48 = vpop.f32.mrb[34].mxu1 }
 0x2f1   : > { %v7729_v6 = vsub.f32 %v7560_v34, %v5354_v48  ;;  %v3252_v2 = vpop.f32.mrb[35].mxu1 }
 0x2f2   : > { %v7732_v46 = vsub.f32 %v7563_v50, %v3252_v2  ;;  %5429 = vmatprep.mubr.f32.mxu1 %v3433_v35 }
 0x2f3   : > { %5430 = vmatmul.mubr.f32.vlgmr.msra.gmra.mrb[64].mxu1 %v3434_v17  ;;  %v3436_v56 = vmul.f32 %v7729_v6, %v7729_v6 }
 0x2f4   : > { %v3435_v31 = vmul.f32 %v7732_v46, %v7732_v46  ;;  %v5357_v60 = vpop.f32.mrb[36].mxu1 }
 0x2f5   : > { %v7739_v14 = vsub.f32 %v7570_v47, %v5357_v60  ;;  %v3262_v49 = vpop.f32.mrb[37].mxu1 }
 0x2f6   : > { %v7742_v34 = vsub.f32 %v7573_v7, %v3262_v49  ;;  %5432 = vmatprep.mubr.f32.mxu1 %v3435_v31 }
 0x2f7   : > { %5433 = vmatmul.mubr.f32.gmra.mrb[66].mxu1 %v3436_v56  ;;  %v3438_v0 = vmul.f32 %v7739_v14, %v7739_v14 }
 0x2f8   : > { %v3437_v50 = vmul.f32 %v7742_v34, %v7742_v34  ;;  %v5360_v21 = vpop.f32.mrb[38].mxu1 }
 0x2f9   : > { %v7749_v15 = vsub.f32 %v7580_v4, %v5360_v21  ;;  %v3272_v8 = vpop.f32.mrb[39].mxu1 }
 0x2fa   : > { %v7752_v47 = vsub.f32 %v7583_v40, %v3272_v8  ;;  %5435 = vmatprep.mubr.f32.mxu1 %v3437_v50 }
 0x2fb   : > { %5436 = vmatmul.mubr.f32.gmra.mrb[68].mxu1 %v3438_v0  ;;  %v3440_v12 = vmul.f32 %v7749_v15, %v7749_v15 }
 0x2fc   : > { %v3439_v7 = vmul.f32 %v7752_v47, %v7752_v47  ;;  %v5363_v45 = vpop.f32.mrb[40].mxu1 }
 0x2fd   : > { %v7759_v33 = vsub.f32 %v7592_v5, %v5363_v45  ;;  %v3282_v37 = vpop.f32.mrb[41].mxu1 }
 0x2fe   : > { %v7762_v4 = vsub.f32 %v7595_v54, %v3282_v37  ;;  %5438 = vmatprep.mubr.f32.mxu1 %v3439_v7 }
 0x2ff   : > { %5439 = vmatmul.mubr.f32.gmra.mrb[70].mxu1 %v3440_v12  ;;  %v3442_v3 = vmul.f32 %v7759_v33, %v7759_v33 }
 0x300   : > { %v3441_v40 = vmul.f32 %v7762_v4, %v7762_v4  ;;  %v5366_v44 = vpop.f32.mrb[42].mxu1 }
 0x301   : > { %v7769_v28 = vsub.f32 %v7604_v62, %v5366_v44  ;;  %v3292_v61 = vpop.f32.mrb[43].mxu1 }
 0x302   : > { %v7772_v5 = vsub.f32 %v7607_v38, %v3292_v61  ;;  %5441 = vmatprep.mubr.f32.mxu1 %v3441_v40 }
 0x303   : > { %5442 = vmatmul.mubr.f32.gmra.mrb[72].mxu1 %v3442_v3  ;;  %v3444_v55 = vmul.f32 %v7769_v28, %v7769_v28 }
 0x304   : > { %v3443_v54 = vmul.f32 %v7772_v5, %v7772_v5  ;;  %v5369_v59 = vpop.f32.mrb[44].mxu1 }
 0x305   : > { %v7779_v39 = vsub.f32 %v7616_v36, %v5369_v59  ;;  %v3302_v18 = vpop.f32.mrb[45].mxu1 }
 0x306   : > { %v7782_v62 = vsub.f32 %v7619_v27, %v3302_v18  ;;  %5444 = vmatprep.mubr.f32.mxu1 %v3443_v54 }
 0x307   : > { %5445 = vmatmul.mubr.f32.gmra.mrb[74].mxu1 %v3444_v55  ;;  %v3446_v19 = vmul.f32 %v7779_v39, %v7779_v39 }
 0x308   : > { %v3445_v38 = vmul.f32 %v7782_v62, %v7782_v62  ;;  %v5372_v52 = vpop.f32.mrb[46].mxu1 }
 0x309   : > { %v7789_v58 = vsub.f32 %v7628_v26, %v5372_v52  ;;  %v3312_v42 = vpop.f32.mrb[47].mxu1 }
 0x30a   : > { %v7792_v36 = vsub.f32 %v7631_v24, %v3312_v42  ;;  %5447 = vmatprep.mubr.f32.mxu1 %v3445_v38 }
 0x30b   : > { %5448 = vmatmul.mubr.f32.gmra.mrb[76].mxu1 %v3446_v19  ;;  %v3448_v35 = vmul.f32 %v7789_v58, %v7789_v58 }
 0x30c   : > { %v3447_v27 = vmul.f32 %v7792_v36, %v7792_v36  ;;  %v5375_v16 = vpop.f32.mrb[48].mxu1 }
 0x30d   : > { %v7799_v48 = vsub.f32 %v7640_v11, %v5375_v16  ;;  %v3322_v17 = vpop.f32.mrb[49].mxu1 }
 0x30e   : > { %v7802_v26 = vsub.f32 %v7643_v53, %v3322_v17  ;;  %5450 = vmatprep.mubr.f32.mxu1 %v3447_v27 }
 0x30f   : > { %5451 = vmatmul.mubr.f32.gmra.mrb[78].mxu1 %v3448_v35  ;;  %v3450_v31 = vmul.f32 %v7799_v48, %v7799_v48 }
 0x310   : > { %v3449_v24 = vmul.f32 %v7802_v26, %v7802_v26  ;;  %v5378_v2 = vpop.f32.mrb[50].mxu1 }
 0x311   : > { %v7809_v60 = vsub.f32 %v7651_v25, %v5378_v2  ;;  %v3332_v56 = vpop.f32.mrb[51].mxu1 }
 0x312   : > { %v7812_v11 = vsub.f32 %v7654_v63, %v3332_v56  ;;  %5453 = vmatprep.mubr.f32.mxu1 %v3449_v24 }
 0x313   : > { %5454 = vmatmul.mubr.f32.gmra.mrb[80].mxu1 %v3450_v31  ;;  %v3452_v50 = vmul.f32 %v7809_v60, %v7809_v60 }
 0x314   : > { %v3451_v53 = vmul.f32 %v7812_v11, %v7812_v11  ;;  %v5381_v49 = vpop.f32.mrb[52].mxu1 }
 0x315   : > { %v7819_v21 = vsub.f32 %v7661_v57, %v5381_v49  ;;  %v3342_v0 = vpop.f32.mrb[53].mxu1 }
 0x316   : > { %v7822_v25 = vsub.f32 %v7664_v29, %v3342_v0  ;;  %5456 = vmatprep.mubr.f32.mxu1 %v3451_v53 }
 0x317   : > { %5457 = vmatmul.mubr.f32.gmra.mrb[82].mxu1 %v3452_v50  ;;  %v3454_v7 = vmul.f32 %v7819_v21, %v7819_v21 }
 0x318   : > { %v3453_v63 = vmul.f32 %v7822_v25, %v7822_v25  ;;  %v5384_v8 = vpop.f32.mrb[54].mxu1 }
 0x319   : > { %v7829_v45 = vsub.f32 %v7671_v1, %v5384_v8  ;;  %v3352_v12 = vpop.f32.mrb[55].mxu1 }
 0x31a   : > { %v7832_v57 = vsub.f32 %v7674_v23, %v3352_v12  ;;  %5459 = vmatprep.mubr.f32.mxu1 %v3453_v63 }
 0x31b   : > { %5460 = vmatmul.mubr.f32.gmra.mrb[84].mxu1 %v3454_v7  ;;  %v3456_v40 = vmul.f32 %v7829_v45, %v7829_v45 }
 0x31c   : > { %v3455_v29 = vmul.f32 %v7832_v57, %v7832_v57  ;;  %v5387_v37 = vpop.f32.mrb[56].mxu1 }
 0x31d   : > { %v7839_v44 = vsub.f32 %v7681_v13, %v5387_v37  ;;  %v3362_v3 = vpop.f32.mrb[57].mxu1 }
 0x31e   : > { %v7842_v1 = vsub.f32 %v7684_v51, %v3362_v3  ;;  %5462 = vmatprep.mubr.f32.mxu1 %v3455_v29  ;;  %v7881_v29 = vld [vmem:[%s8029_s4] ss:$0 sm:$0xff] }
 0x31f   : > { %5463 = vmatmul.mubr.f32.gmra.mrb[86].mxu1 %v3456_v40  ;;  %v3458_v54 = vmul.f32 %v7839_v44, %v7839_v44 }
 0x320   : > { %v3457_v23 = vmul.f32 %v7842_v1, %v7842_v1  ;;  %v5390_v61 = vpop.f32.mrb[58].mxu1 }
 0x321   : > { %v7849_v59 = vsub.f32 %v7691_v32, %v5390_v61  ;;  %v3372_v55 = vpop.f32.mrb[59].mxu1 }
 0x322   : > { %v7852_v13 = vsub.f32 %v7694_v9, %v3372_v55  ;;  %5465 = vmatprep.mubr.f32.mxu1 %v3457_v23 }
 0x323   : > { %5466 = vmatmul.mubr.f32.gmra.mrb[88].mxu1 %v3458_v54  ;;  %v3460_v38 = vmul.f32 %v7849_v59, %v7849_v59  ;;  %v7888_v54 = vld [vmem:[%s8030_s5] ss:$0 sm:$0xff] }
 0x324   : > { %v3459_v51 = vmul.f32 %v7852_v13, %v7852_v13  ;;  %v5393_v18 = vpop.f32.mrb[60].mxu1 }
 0x325   : > { %v7859_v52 = vsub.f32 %v7701_v10, %v5393_v18  ;;  %v3382_v19 = vpop.f32.mrb[61].mxu1 }
 0x326   : > { %v7862_v32 = vsub.f32 %v7704_v41, %v3382_v19  ;;  %5468 = vmatprep.mubr.f32.mxu1 %v3459_v51 }
 0x327   : > { %5469 = vmatmul.mubr.f32.gmra.mrb[90].mxu1 %v3460_v38  ;;  %v3462_v27 = vmul.f32 %v7859_v52, %v7859_v52 }
 0x328   : > { %v3461_v9 = vmul.f32 %v7862_v32, %v7862_v32  ;;  %v5396_v42 = vpop.f32.mrb[62].mxu1 }
 0x329   : > { %v7869_v16 = vsub.f32 %v7711_v43, %v5396_v42  ;;  %v3392_v35 = vpop.f32.mrb[63].mxu1 }
 0x32a   : > { %v7872_v10 = vsub.f32 %v7714_v30, %v3392_v35  ;;  %5471 = vmatprep.mubr.f32.mxu1 %v3461_v9 }
 0x32b   : > { %5472 = vmatmul.mubr.f32.gmra.mrb[92].mxu1 %v3462_v27  ;;  %v3464_v17 = vmul.f32 %v7869_v16, %v7869_v16 }
 0x32c   : > { %v3463_v41 = vmul.f32 %v7872_v10, %v7872_v10 }
 0x32e   : > { %5474 = vmatprep.mubr.f32.mxu1 %v3463_v41 }
 0x32f   : > { %5475 = vmatmul.mubr.f32.gmra.mrb[94].mxu1 %v3464_v17 }
 0x3c6   : > { %v5431_v24 = vpop.f32.mrb[64].mxu1 }
 0x3c7   : > { %v3537_v2 = vadd.f32 1e-05, %v5431_v24  ;;  %v3531_v31 = vpop.f32.mrb[65].mxu1 }
 0x3c8   : > { %v3532_v56 = vadd.f32 1e-05, %v3531_v31 }
 0x3c9   : > { %5990 = vrsqrt.f32 %v3537_v2 }
 0x3ca   : > { %5992 = vrsqrt.f32 %v3532_v56  ;;  %v5434_v43 = vpop.f32.mrb[66].mxu1 }
 0x3cb   : > { %v3547_v53 = vadd.f32 1e-05, %v5434_v43  ;;  %v3541_v30 = vpop.f32.mrb[67].mxu1 }
 0x3cc   : > { %v3542_v49 = vadd.f32 1e-05, %v3541_v30 }
 0x3cd   : > { %5994 = vrsqrt.f32 %v3547_v53 }
 0x3ce   : > { %5996 = vrsqrt.f32 %v3542_v49  ;;  %v5437_v50 = vpop.f32.mrb[68].mxu1 }
 0x3cf   : > { %v3557_v0 = vadd.f32 1e-05, %v5437_v50  ;;  %v3551_v63 = vpop.f32.mrb[69].mxu1 }
 0x3d0   : > { %v3552_v8 = vadd.f32 1e-05, %v3551_v63 }
 0x3d1   : > { %5998 = vrsqrt.f32 %v3557_v0 }
 0x3d2   : > { %6000 = vrsqrt.f32 %v3552_v8  ;;  %v5440_v7 = vpop.f32.mrb[70].mxu1 }
 0x3d3   : > { %v5991_v12 = vpop.eup %5990  ;;  %v3567_v37 = vadd.f32 1e-05, %v5440_v7  ;;  %v3561_v40 = vpop.f32.mrb[71].mxu1 }
 0x3d4   : > { %v5993_v3 = vpop.eup %5992  ;;  %v3723_v23 = vmul.f32 %v5991_v12, %v7719_v20  ;;  %v3562_v61 = vadd.f32 1e-05, %v3561_v40 }
 0x3d5   : > { %v3722_v55 = vmul.f32 %v5993_v3, %v7722_v22  ;;  %6002 = vrsqrt.f32 %v3567_v37 }
 0x3d6   : > { %v3762_v51 = vmul.f32 %v7881_v29, %v3723_v23  ;;  %6004 = vrsqrt.f32 %v3562_v61  ;;  %v5443_v18 = vpop.f32.mrb[72].mxu1 }
 0x3d7   : > { %v5995_v38 = vpop.eup %5994  ;;  %v3761_v20 = vmul.f32 %v7881_v29, %v3722_v55  ;;  %v3577_v19 = vadd.f32 1e-05, %v5443_v18  ;;  %v3571_v9 = vpop.f32.mrb[73].mxu1 }
 0x3d8   : > { %v5997_v42 = vpop.eup %5996  ;;  %v3801_v22 = vadd.f32 %v7888_v54, %v3762_v51  ;;  %v3725_v27 = vmul.f32 %v5995_v38, %v7729_v6  ;;  %v3572_v35 = vadd.f32 1e-05, %v3571_v9 }
 0x3d9   : > { %v3800_v41 = vadd.f32 %v7888_v54, %v3761_v20  ;;  %v3724_v17 = vmul.f32 %v5997_v42, %v7732_v46  ;;  %6006 = vrsqrt.f32 %v3577_v19 }
 0x3da   : > { %3833 = vst [vmem:[%s7895_s22 + $0x8] sm:$0xff] %v3801_v22  ;;  %v3764_v24 = vmul.f32 %v7881_v29, %v3725_v27  ;;  %6008 = vrsqrt.f32 %v3572_v35  ;;  %v5446_v2 = vpop.f32.mrb[74].mxu1 }
 0x3db   : > { %v5999_v31 = vpop.eup %5998  ;;  %3832 = vst [vmem:[%s7895_s22] sm:$0xff] %v3800_v41  ;;  %v3763_v56 = vmul.f32 %v7881_v29, %v3724_v17  ;;  %v3587_v43 = vadd.f32 1e-05, %v5446_v2  ;;  %v3581_v53 = vpop.f32.mrb[75].mxu1 }
 0x3dc   : > { %v6001_v6 = vpop.eup %6000  ;;  %v3803_v30 = vadd.f32 %v7888_v54, %v3764_v24  ;;  %v3727_v49 = vmul.f32 %v5999_v31, %v7739_v14  ;;  %v3582_v46 = vadd.f32 1e-05, %v3581_v53 }
 0x3dd   : > { %v3802_v50 = vadd.f32 %v7888_v54, %v3763_v56  ;;  %v3726_v0 = vmul.f32 %v6001_v6, %v7742_v34  ;;  %6010 = vrsqrt.f32 %v3587_v43 }
 0x3de   : > { %3835 = vst [vmem:[%s7895_s22 + $0x18] sm:$0xff] %v3803_v30  ;;  %v3766_v63 = vmul.f32 %v7881_v29, %v3727_v49  ;;  %6012 = vrsqrt.f32 %v3582_v46  ;;  %v5449_v8 = vpop.f32.mrb[76].mxu1 }
 0x3df   : > { %v6003_v7 = vpop.eup %6002  ;;  %3834 = vst [vmem:[%s7895_s22 + $0x10] sm:$0xff] %v3802_v50  ;;  %v3765_v12 = vmul.f32 %v7881_v29, %v3726_v0  ;;  %v3597_v37 = vadd.f32 1e-05, %v5449_v8  ;;  %v3591_v40 = vpop.f32.mrb[77].mxu1 }
 0x3e0   : > { %v6005_v14 = vpop.eup %6004  ;;  %v3805_v3 = vadd.f32 %v7888_v54, %v3766_v63  ;;  %v3729_v23 = vmul.f32 %v6003_v7, %v7749_v15  ;;  %v3592_v34 = vadd.f32 1e-05, %v3591_v40 }
 0x3e1   : > { %v3804_v61 = vadd.f32 %v7888_v54, %v3765_v12  ;;  %v3728_v55 = vmul.f32 %v6005_v14, %v7752_v47  ;;  %6014 = vrsqrt.f32 %v3597_v37 }
 0x3e2   : > { %3837 = vst [vmem:[%s7895_s22 + $0x28] sm:$0xff] %v3805_v3  ;;  %v3768_v51 = vmul.f32 %v7881_v29, %v3729_v23  ;;  %6016 = vrsqrt.f32 %v3592_v34  ;;  %v5452_v18 = vpop.f32.mrb[78].mxu1 }
 0x3e3   : > { %v6007_v38 = vpop.eup %6006  ;;  %3836 = vst [vmem:[%s7895_s22 + $0x20] sm:$0xff] %v3804_v61  ;;  %v3767_v20 = vmul.f32 %v7881_v29, %v3728_v55  ;;  %v3607_v19 = vadd.f32 1e-05, %v5452_v18  ;;  %v3601_v9 = vpop.f32.mrb[79].mxu1 }
 0x3e4   : > { %v6009_v15 = vpop.eup %6008  ;;  %v3807_v42 = vadd.f32 %v7888_v54, %v3768_v51  ;;  %v3731_v22 = vmul.f32 %v6007_v38, %v7759_v33  ;;  %v3602_v47 = vadd.f32 1e-05, %v3601_v9 }
 0x3e5   : > { %v3806_v27 = vadd.f32 %v7888_v54, %v3767_v20  ;;  %v3730_v35 = vmul.f32 %v6009_v15, %v7762_v4  ;;  %6018 = vrsqrt.f32 %v3607_v19 }
 0x3e6   : > { %3839 = vst [vmem:[%s7895_s22 + $0x38] sm:$0xff] %v3807_v42  ;;  %v3770_v41 = vmul.f32 %v7881_v29, %v3731_v22  ;;  %6020 = vrsqrt.f32 %v3602_v47  ;;  %v5455_v17 = vpop.f32.mrb[80].mxu1 }
 0x3e7   : > { %v6011_v24 = vpop.eup %6010  ;;  %3838 = vst [vmem:[%s7895_s22 + $0x30] sm:$0xff] %v3806_v27  ;;  %v3769_v2 = vmul.f32 %v7881_v29, %v3730_v35  ;;  %v3617_v31 = vadd.f32 1e-05, %v5455_v17  ;;  %v3611_v56 = vpop.f32.mrb[81].mxu1 }
 0x3e8   : > { %v6013_v33 = vpop.eup %6012  ;;  %v3809_v43 = vadd.f32 %v7888_v54, %v3770_v41  ;;  %v3733_v53 = vmul.f32 %v6011_v24, %v7769_v28  ;;  %v3612_v4 = vadd.f32 1e-05, %v3611_v56 }
 0x3e9   : > { %v3808_v6 = vadd.f32 %v7888_v54, %v3769_v2  ;;  %v3732_v30 = vmul.f32 %v6013_v33, %v7772_v5  ;;  %6022 = vrsqrt.f32 %v3617_v31 }
 0x3ea   : > { %3841 = vst [vmem:[%s7895_s22 + $0x48] sm:$0xff] %v3809_v43  ;;  %v3772_v49 = vmul.f32 %v7881_v29, %v3733_v53  ;;  %6024 = vrsqrt.f32 %v3612_v4  ;;  %v5458_v46 = vpop.f32.mrb[82].mxu1 }
 0x3eb   : > { %v6015_v50 = vpop.eup %6014  ;;  %3840 = vst [vmem:[%s7895_s22 + $0x40] sm:$0xff] %v3808_v6  ;;  %v3771_v0 = vmul.f32 %v7881_v29, %v3732_v30  ;;  %v3627_v63 = vadd.f32 1e-05, %v5458_v46  ;;  %v3621_v8 = vpop.f32.mrb[83].mxu1 }
 0x3ec   : > { %v6017_v28 = vpop.eup %6016  ;;  %v3811_v7 = vadd.f32 %v7888_v54, %v3772_v49  ;;  %v3735_v12 = vmul.f32 %v6015_v50, %v7779_v39  ;;  %v3622_v5 = vadd.f32 1e-05, %v3621_v8 }
 0x3ed   : > { %v3810_v37 = vadd.f32 %v7888_v54, %v3771_v0  ;;  %v3734_v40 = vmul.f32 %v6017_v28, %v7782_v62  ;;  %6026 = vrsqrt.f32 %v3627_v63 }
 0x3ee   : > { %3843 = vst [vmem:[%s7895_s22 + $0x58] sm:$0xff] %v3811_v7  ;;  %v3774_v14 = vmul.f32 %v7881_v29, %v3735_v12  ;;  %6028 = vrsqrt.f32 %v3622_v5  ;;  %v5461_v3 = vpop.f32.mrb[84].mxu1 }
 0x3ef   : > { %v6019_v23 = vpop.eup %6018  ;;  %3842 = vst [vmem:[%s7895_s22 + $0x50] sm:$0xff] %v3810_v37  ;;  %v3773_v34 = vmul.f32 %v7881_v29, %v3734_v40  ;;  %v3637_v61 = vadd.f32 1e-05, %v5461_v3  ;;  %v3631_v55 = vpop.f32.mrb[85].mxu1 }
 0x3f0   : > { %v6021_v39 = vpop.eup %6020  ;;  %v3813_v51 = vadd.f32 %v7888_v54, %v3774_v14  ;;  %v3737_v18 = vmul.f32 %v6019_v23, %v7789_v58  ;;  %v3632_v62 = vadd.f32 1e-05, %v3631_v55 }
 0x3f1   : > { %v3812_v38 = vadd.f32 %v7888_v54, %v3773_v34  ;;  %v3736_v20 = vmul.f32 %v6021_v39, %v7792_v36  ;;  %6030 = vrsqrt.f32 %v3637_v61 }
 0x3f2   : > { %3845 = vst [vmem:[%s7895_s22 + $0x68] sm:$0xff] %v3813_v51  ;;  %v3776_v19 = vmul.f32 %v7881_v29, %v3737_v18  ;;  %6032 = vrsqrt.f32 %v3632_v62  ;;  %v5464_v9 = vpop.f32.mrb[86].mxu1 }
 0x3f3   : > { %v6023_v15 = vpop.eup %6022  ;;  %3844 = vst [vmem:[%s7895_s22 + $0x60] sm:$0xff] %v3812_v38  ;;  %v3775_v42 = vmul.f32 %v7881_v29, %v3736_v20  ;;  %v3647_v22 = vadd.f32 1e-05, %v5464_v9  ;;  %v3641_v47 = vpop.f32.mrb[87].mxu1 }
 0x3f4   : > { %v6025_v58 = vpop.eup %6024  ;;  %v3815_v27 = vadd.f32 %v7888_v54, %v3776_v19  ;;  %v3739_v35 = vmul.f32 %v6023_v15, %v7799_v48  ;;  %v3642_v36 = vadd.f32 1e-05, %v3641_v47 }
 0x3f5   : > { %v3814_v41 = vadd.f32 %v7888_v54, %v3775_v42  ;;  %v3738_v17 = vmul.f32 %v6025_v58, %v7802_v26  ;;  %6034 = vrsqrt.f32 %v3647_v22 }
 0x3f6   : > { %3847 = vst [vmem:[%s7895_s22 + $0x78] sm:$0xff] %v3815_v27  ;;  %v3778_v24 = vmul.f32 %v7881_v29, %v3739_v35  ;;  %6036 = vrsqrt.f32 %v3642_v36  ;;  %v5467_v2 = vpop.f32.mrb[88].mxu1 }
 0x3f7   : > { %v6027_v31 = vpop.eup %6026  ;;  %3846 = vst [vmem:[%s7895_s22 + $0x70] sm:$0xff] %v3814_v41  ;;  %v3777_v56 = vmul.f32 %v7881_v29, %v3738_v17  ;;  %v3657_v33 = vadd.f32 1e-05, %v5467_v2  ;;  %v3651_v43 = vpop.f32.mrb[89].mxu1 }
 0x3f8   : > { %v6029_v48 = vpop.eup %6028  ;;  %v3817_v53 = vadd.f32 %v7888_v54, %v3778_v24  ;;  %v3741_v4 = vmul.f32 %v6027_v31, %v7809_v60  ;;  %v3652_v26 = vadd.f32 1e-05, %v3651_v43 }
 0x3f9   : > { %v3816_v6 = vadd.f32 %v7888_v54, %v3777_v56  ;;  %v3740_v30 = vmul.f32 %v6029_v48, %v7812_v11  ;;  %6038 = vrsqrt.f32 %v3657_v33 }
 0x3fa   : > { %3849 = vst [vmem:[%s7895_s22 + $0x88] sm:$0xff] %v3817_v53  ;;  %v3780_v49 = vmul.f32 %v7881_v29, %v3741_v4  ;;  %6040 = vrsqrt.f32 %v3652_v26  ;;  %v5470_v46 = vpop.f32.mrb[90].mxu1 }
 0x3fb   : > { %v6031_v50 = vpop.eup %6030  ;;  %3848 = vst [vmem:[%s7895_s22 + $0x80] sm:$0xff] %v3816_v6  ;;  %v3779_v0 = vmul.f32 %v7881_v29, %v3740_v30  ;;  %v3667_v63 = vadd.f32 1e-05, %v5470_v46  ;;  %v3661_v8 = vpop.f32.mrb[91].mxu1 }
 0x3fc   : > { %v6033_v60 = vpop.eup %6032  ;;  %v3819_v28 = vadd.f32 %v7888_v54, %v3780_v49  ;;  %v3743_v7 = vmul.f32 %v6031_v50, %v7819_v21  ;;  %v3662_v11 = vadd.f32 1e-05, %v3661_v8 }
 0x3fd   : > { %v3818_v12 = vadd.f32 %v7888_v54, %v3779_v0  ;;  %v3742_v5 = vmul.f32 %v6033_v60, %v7822_v25  ;;  %6042 = vrsqrt.f32 %v3667_v63 }
 0x3fe   : > { %3851 = vst [vmem:[%s7895_s22 + $0x98] sm:$0xff] %v3819_v28  ;;  %v3782_v37 = vmul.f32 %v7881_v29, %v3743_v7  ;;  %6044 = vrsqrt.f32 %v3662_v11  ;;  %v5473_v40 = vpop.f32.mrb[92].mxu1 }
 0x3ff   : > { %v6035_v14 = vpop.eup %6034  ;;  %3850 = vst [vmem:[%s7895_s22 + $0x90] sm:$0xff] %v3818_v12  ;;  %v3781_v3 = vmul.f32 %v7881_v29, %v3742_v5  ;;  %v3677_v23 = vadd.f32 1e-05, %v5473_v40  ;;  %v3671_v34 = vpop.f32.mrb[93].mxu1 }
 0x400   : > { %v6037_v21 = vpop.eup %6036  ;;  %v3821_v61 = vadd.f32 %v7888_v54, %v3782_v37  ;;  %v3745_v55 = vmul.f32 %v6035_v14, %v7829_v45  ;;  %v3672_v25 = vadd.f32 1e-05, %v3671_v34 }
 0x401   : > { %v3820_v39 = vadd.f32 %v7888_v54, %v3781_v3  ;;  %v3744_v51 = vmul.f32 %v6037_v21, %v7832_v57  ;;  %6046 = vrsqrt.f32 %v3677_v23 }
 0x402   : > { %3853 = vst [vmem:[%s7895_s22 + $0xa8] sm:$0xff] %v3821_v61  ;;  %v3784_v18 = vmul.f32 %v7881_v29, %v3745_v55  ;;  %6048 = vrsqrt.f32 %v3672_v25  ;;  %v5476_v62 = vpop.f32.mrb[94].mxu1 }
 0x403   : > { %v6039_v38 = vpop.eup %6038  ;;  %3852 = vst [vmem:[%s7895_s22 + $0xa0] sm:$0xff] %v3820_v39  ;;  %v3783_v20 = vmul.f32 %v7881_v29, %v3744_v51  ;;  %v3687_v19 = vadd.f32 1e-05, %v5476_v62  ;;  %v3681_v9 = vpop.f32.mrb[95].mxu1 }
 0x404   : > { %v6041_v45 = vpop.eup %6040  ;;  %v3823_v15 = vadd.f32 %v7888_v54, %v3784_v18  ;;  %v3747_v42 = vmul.f32 %v6039_v38, %v7839_v44  ;;  %v3682_v57 = vadd.f32 1e-05, %v3681_v9 }
 0x405   : > { %v3822_v22 = vadd.f32 %v7888_v54, %v3783_v20  ;;  %v3746_v47 = vmul.f32 %v6041_v45, %v7842_v1  ;;  %6050 = vrsqrt.f32 %v3687_v19 }
 0x406   : > { %3855 = vst [vmem:[%s7895_s22 + $0xb8] sm:$0xff] %v3823_v15  ;;  %v3786_v58 = vmul.f32 %v7881_v29, %v3747_v42  ;;  %6052 = vrsqrt.f32 %v3682_v57 }
 0x407   : > { %v6043_v27 = vpop.eup %6042  ;;  %3854 = vst [vmem:[%s7895_s22 + $0xb0] sm:$0xff] %v3822_v22  ;;  %v3785_v35 = vmul.f32 %v7881_v29, %v3746_v47 }
 0x408   : > { %v6045_v36 = vpop.eup %6044  ;;  %v3825_v44 = vadd.f32 %v7888_v54, %v3786_v58  ;;  %v3749_v41 = vmul.f32 %v6043_v27, %v7849_v59 }
 0x409   : > { %v3824_v17 = vadd.f32 %v7888_v54, %v3785_v35  ;;  %v3748_v1 = vmul.f32 %v6045_v36, %v7852_v13 }
 0x40a   : > { %3857 = vst [vmem:[%s7895_s22 + $0xc8] sm:$0xff] %v3825_v44  ;;  %v3788_v24 = vmul.f32 %v7881_v29, %v3749_v41 }
 0x40b   : > { %v6047_v2 = vpop.eup %6046  ;;  %3856 = vst [vmem:[%s7895_s22 + $0xc0] sm:$0xff] %v3824_v17  ;;  %v3787_v31 = vmul.f32 %v7881_v29, %v3748_v1 }
 0x40c   : > { %v6049_v56 = vpop.eup %6048  ;;  %v3827_v33 = vadd.f32 %v7888_v54, %v3788_v24  ;;  %v3751_v43 = vmul.f32 %v6047_v2, %v7859_v52 }
 0x40d   : > { %v3826_v59 = vadd.f32 %v7888_v54, %v3787_v31  ;;  %v3750_v48 = vmul.f32 %v6049_v56, %v7862_v32 }
 0x40e   : > { %3859 = vst [vmem:[%s7895_s22 + $0xd8] sm:$0xff] %v3827_v33  ;;  %v3790_v13 = vmul.f32 %v7881_v29, %v3751_v43 }
 0x40f   : > { %v6051_v53 = vpop.eup %6050  ;;  %3858 = vst [vmem:[%s7895_s22 + $0xd0] sm:$0xff] %v3826_v59  ;;  %v3789_v4 = vmul.f32 %v7881_v29, %v3750_v48 }
 0x410   : > { %v6053_v26 = vpop.eup %6052  ;;  %v3829_v6 = vadd.f32 %v7888_v54, %v3790_v13  ;;  %v3753_v30 = vmul.f32 %v6051_v53, %v7869_v16 }
 0x411   : > { %v3828_v52 = vadd.f32 %v7888_v54, %v3789_v4  ;;  %v3752_v49 = vmul.f32 %v6053_v26, %v7872_v10 }
 0x412   : > { %3861 = vst [vmem:[%s7895_s22 + $0xe8] sm:$0xff] %v3829_v6  ;;  %v3792_v32 = vmul.f32 %v7881_v29, %v3753_v30 }
 0x413   : > { %3860 = vst [vmem:[%s7895_s22 + $0xe0] sm:$0xff] %v3828_v52  ;;  %v3791_v46 = vmul.f32 %v7881_v29, %v3752_v49 }
 0x414   : > { %v3831_v50 = vadd.f32 %v7888_v54, %v3792_v32 }
 0x415   : > { %v3830_v0 = vadd.f32 %v7888_v54, %v3791_v46 }
 0x416   : > { %3863 = vst [vmem:[%s7895_s22 + $0xf8] sm:$0xff] %v3831_v50 }
 0x417   : > { %3862 = vst [vmem:[%s7895_s22 + $0xf0] sm:$0xff] %v3830_v0 }
 0x418 PF: > { %s16_s21 = sadd.s32 1, %s6060_s21  }
 0x419   : > { %p13_p4 = scmp.ge.s32.totalorder %s16_s21, 4  }
 0x41b   :  { %15 = sbr.rel (!%p13_p4) target bundleno = 1 (0x1), region = 82 }

</bundles_post_ra>
